<compile_context>
chip_gen: v5e
topology: v5e:2x2
jax: 0.10.0
libtpu: 0.0.40
codegen_flags: <defaults>
</compile_context>

<pallas_src>
import functools

import jax
import jax.numpy as jnp
from jax import lax
from jax.experimental import pallas as pl
from jax.experimental.pallas import tpu as pltpu


_LANE = 128
_SUBLANE = 8
_HIDDEN = 300        # PyTorch Agent hidden width
_HIDDEN_PAD = 384    # next multiple of 128 (zero padding keeps the math exact)


def _round_up(x, m):
    return ((x + m - 1) // m) * m


def _vmem_capacity_bytes():
    """Physical VMEM of the local TPU (fallback: conservative 64 MiB = v7x)."""
    try:
        return int(pltpu.get_tpu_info().vmem_capacity_bytes)
    except Exception:
        return 64 * 1024 * 1024


# -----------------------------------------------------------------------------
# Kernel
# -----------------------------------------------------------------------------
def _mlp_head_kernel(emb_ref, w1_ref, b1_ref, w2_ref, b2_ref, w3_ref, b3_ref,
                     out_ref, acc_ref, *, apply_softmax, out_dim):
    """grid = (batch_blocks, seq_blocks); seq is the sequential reduction axis.

    emb_ref : (TB, TS, H) tile in the producer's dtype (no wrapper cast/pad).
    acc_ref : (TB, H) f32 streamed mean-pool accumulator (1/S folded into W1).
    """
    s = pl.program_id(1)

    @pl.when(s == 0)
    def _():
        acc_ref[...] = jnp.zeros_like(acc_ref)

    # Streamed pooling: only the (TB, H) f32 accumulator stays live; the
    # convert + add is hidden under the embedding-tile DMA.
    acc_ref[...] += jnp.sum(emb_ref[...], axis=1, dtype=jnp.float32)

    @pl.when(s == pl.num_programs(1) - 1)
    def _():
        pooled = acc_ref[...]                                     # (TB, H) f32

        # Linear(H, 300) + ReLU   (bf16 MXU inputs, f32 accumulation)
        h1 = jnp.dot(pooled.astype(jnp.bfloat16), w1_ref[...],
                     preferred_element_type=jnp.float32) + b1_ref[...]
        h1 = jnp.maximum(h1, 0.0)

        # Linear(300, 300) + ReLU
        h2 = jnp.dot(h1.astype(jnp.bfloat16), w2_ref[...],
                     preferred_element_type=jnp.float32) + b2_ref[...]
        h2 = jnp.maximum(h2, 0.0)

        # Linear(300, out_dim) — output slab padded to a multiple of 128 lanes.
        y = jnp.dot(h2.astype(jnp.bfloat16), w3_ref[...],
                    preferred_element_type=jnp.float32) + b3_ref[...]

        if apply_softmax:
            # Softmax(dim=1) over the real out_dim columns only, exact division
            # (probabilities feed a Categorical -> no approx reciprocal).
            col = lax.broadcasted_iota(jnp.int32, y.shape, 1)
            y = jnp.where(col < out_dim, y, jnp.float32(-1e30))
            m = jnp.max(y, axis=1, keepdims=True)
            e = jnp.exp(y - m)
            y = e / jnp.sum(e, axis=1, keepdims=True)

        out_ref[...] = y.astype(out_ref.dtype)


# -----------------------------------------------------------------------------
# Wrapper helpers
# -----------------------------------------------------------------------------
def _prepare_head(params, seq_len, out_pad):
    """Zero-pad weights to lane-aligned widths (exact math), fold the 1/S
    mean-pool scale into W1, and cast MXU inputs to bf16 (biases stay f32).
    These are tiny (<1 MiB) one-off transforms; the big embedding tensor is
    NOT touched on the host side."""
    w1, b1, w2, b2, w3, b3 = params

    def pad2(a, rows, cols):
        return jnp.pad(a, ((0, rows - a.shape[0]), (0, cols - a.shape[1])))

    w1p = pad2(w1 * (1.0 / seq_len), w1.shape[0], _HIDDEN_PAD).astype(jnp.bfloat16)
    w2p = pad2(w2, _HIDDEN_PAD, _HIDDEN_PAD).astype(jnp.bfloat16)
    w3p = pad2(w3, _HIDDEN_PAD, out_pad).astype(jnp.bfloat16)
    b1p = pad2(b1, 1, _HIDDEN_PAD).astype(jnp.float32)
    b2p = pad2(b2, 1, _HIDDEN_PAD).astype(jnp.float32)
    b3p = pad2(b3, 1, out_pad).astype(jnp.float32)
    return w1p, b1p, w2p, b2p, w3p, b3p


def _choose_tiles(batch, seq, h, itemsize, vmem_cap):
    """Pick (batch tile, seq chunk) so double-buffered tiles + weights fit the
    part's VMEM.  128 MiB parts (v5e/v6e) get larger tiles; 64 MiB parts (v7x)
    get ~8 MiB tiles and >= 2 batch grid steps for both TensorCores."""
    big_vmem = vmem_cap >= (96 << 20)
    tile_target = (24 << 20) if big_vmem else (8 << 20)
    tb_cap = 1024 if big_vmem else 512
    h_lanes = _round_up(h, _LANE)

    # Batch tile.
    if batch <= _SUBLANE:
        tb = batch                                   # block == full batch dim
    else:
        per_row = seq * h_lanes * itemsize
        tb = tile_target // max(per_row, 1)
        tb = max(_SUBLANE, min(tb_cap, (tb // _SUBLANE) * _SUBLANE))
        if not big_vmem:
            # v7x megacore: keep >= 2 batch grid steps to feed both cores.
            tb = min(tb, _round_up(-(-batch // 2), _SUBLANE))
        tb = min(tb, (batch // _SUBLANE) * _SUBLANE)

    # Sequence chunk (reduction grid axis).  Must divide S and be 8-aligned
    # (or equal S) to satisfy the (8, 128) block constraint.
    row_bytes = tb * h_lanes * itemsize
    max_ts = max(1, tile_target // max(row_bytes, 1))
    candidates = [d for d in range(_SUBLANE, seq, _SUBLANE) if seq % d == 0]
    candidates.append(seq)
    fitting = [d for d in candidates if d <= max_ts]
    ts = max(fitting) if fitting else min(candidates)
    return tb, ts, big_vmem


def _run_head(embeddings, params, *, apply_softmax):
    """Run one head (actor or critic) of the Agent on token embeddings."""
    B, S, H = embeddings.shape
    out_dim = params[4].shape[1]
    out_pad = _round_up(max(out_dim, _LANE), _LANE)

    w1p, b1p, w2p, b2p, w3p, b3p = _prepare_head(params, S, out_pad)
    weights = (w1p, b1p, w2p, b2p, w3p, b3p)

    itemsize = jnp.dtype(embeddings.dtype).itemsize
    tb, ts, big_vmem = _choose_tiles(B, S, H, itemsize, _vmem_capacity_bytes())
    grid = (pl.cdiv(B, tb), S // ts)

    kernel = functools.partial(_mlp_head_kernel,
                               apply_softmax=apply_softmax, out_dim=out_dim)

    # VMEM budget: 2x embedding tile + 2x output tile + 1x resident weights +
    # pooled accumulator + headroom.  Never asks for v7x's full 64 MiB.
    h_lanes = _round_up(H, _LANE)
    weight_bytes = ((w1p.size + w2p.size + w3p.size) * 2
                    + (b1p.size + b2p.size + b3p.size) * 4)
    emb_tile = tb * _round_up(ts, _SUBLANE) * h_lanes * itemsize
    out_tile = _round_up(tb, _SUBLANE) * out_pad * 4
    acc_bytes = _round_up(tb, _SUBLANE) * h_lanes * 4
    budget = 2 * emb_tile + 2 * out_tile + weight_bytes + acc_bytes + (4 << 20)
    vmem_limit = int(min((96 << 20) if big_vmem else (40 << 20),
                         max(16 << 20, budget)))

    flops = 2 * B * (H * _HIDDEN_PAD + _HIDDEN_PAD * _HIDDEN_PAD
                     + _HIDDEN_PAD * out_pad)
    bytes_accessed = embeddings.size * itemsize + weight_bytes + B * out_pad * 4
    transcendentals = B * out_pad if apply_softmax else 0

    def make_call(single_buffer_weights):
        def weight_spec(shape):
            if single_buffer_weights:
                # Constant-index resident blocks: one buffer is enough.
                return pl.BlockSpec(shape, lambda i, s: (0, 0),
                                    pipeline_mode=pl.Buffered(1))
            return pl.BlockSpec(shape, lambda i, s: (0, 0))

        return pl.pallas_call(
            kernel,
            out_shape=jax.ShapeDtypeStruct((B, out_pad), jnp.float32),
            grid=grid,
            in_specs=[pl.BlockSpec((tb, ts, H), lambda i, s: (i, s, 0))]
                     + [weight_spec(w.shape) for w in weights],
            out_specs=pl.BlockSpec((tb, out_pad), lambda i, s: (i, 0)),
            scratch_shapes=[pltpu.VMEM((tb, H), jnp.float32)],
            compiler_params=pltpu.CompilerParams(
                dimension_semantics=("parallel", "arbitrary"),
                vmem_limit_bytes=vmem_limit),
            cost_estimate=pl.CostEstimate(
                flops=int(flops),
                transcendentals=int(transcendentals),
                bytes_accessed=int(bytes_accessed)),
        )(embeddings, *weights)

    try:
        out = make_call(single_buffer_weights=True)
    except Exception:
        # Fallback for jax versions without BlockSpec(pipeline_mode=Buffered(1)).
        out = make_call(single_buffer_weights=False)

    return out[:, :out_dim]


# -----------------------------------------------------------------------------
# Agent wrapper (actor XOR critic, as in the PyTorch module)
# -----------------------------------------------------------------------------
def init_agent_params(key, embedding_dim, num_outputs, hidden=_HIDDEN):
    """Parameter init mirroring the Agent's actor/critic Linear shapes."""
    ks = jax.random.split(key, 6)

    def lin(k, fan_in, fan_out):
        scale = 1.0 / jnp.sqrt(jnp.float32(fan_in))
        kw, kb = jax.random.split(k)
        w = jax.random.uniform(kw, (fan_in, fan_out), jnp.float32, -scale, scale)
        b = jax.random.uniform(kb, (1, fan_out), jnp.float32, -scale, scale)
        return w, b

    a1w, a1b = lin(ks[0], embedding_dim, hidden)
    a2w, a2b = lin(ks[1], hidden, hidden)
    a3w, a3b = lin(ks[2], hidden, num_outputs)
    c1w, c1b = lin(ks[3], embedding_dim, hidden)
    c2w, c2b = lin(ks[4], hidden, hidden)
    c3w, c3b = lin(ks[5], hidden, 1)

    return {
        "actor": (a1w, a1b, a2w, a2b, a3w, a3b),
        "critic": (c1w, c1b, c2w, c2b, c3w, c3b),
    }


def agent_forward(embeddings, params, *, is_actor, is_critic):
    """Mirrors Agent.forward (bert_enabled path) on precomputed BERT embeddings.

    Returns:
      actor  -> action probabilities (B, num_outputs)  (Categorical's `probs`)
      critic -> value prediction     (B, 1)
    """
    if is_actor and not is_critic:
        return _run_head(embeddings, params["actor"], apply_softmax=True)
    elif is_critic and not is_actor:
        return _run_head(embeddings, params["critic"], apply_softmax=False)
    else:
        raise TypeError("Agent must be either Actor or Critic.")


# -----------------------------------------------------------------------------
# Main
# -----------------------------------------------------------------------------
if __name__ == "__main__":
    key = jax.random.PRNGKey(0)
    k_emb, k_par = jax.random.split(key)

    # Small, forward-consistent shapes: batch=2, seq=8, hidden=32, outputs=6.
    # (Real BERT: H=768.  The kernel reads the producer's dtype directly —
    #  feed bf16 embeddings to halve HBM traffic; f32 here to match the ref.)
    B, S, H, NUM_OUTPUTS = 2, 8, 32, 6

    # Stand-in for BERTInputModeler output: token embeddings [B, S, H].
    embeddings = jax.random.normal(k_emb, (B, S, H), jnp.float32)

    params = init_agent_params(k_par, embedding_dim=H, num_outputs=NUM_OUTPUTS)

    # Actor path: Categorical(probs) -> we return probs
    probs = agent_forward(embeddings, params, is_actor=True, is_critic=False)
    probs = jax.block_until_ready(probs)

    # Critic path: value prediction (B, 1)
    value = agent_forward(embeddings, params, is_actor=False, is_critic=True)
    value = jax.block_until_ready(value)

    # Pure-JAX f32 reference of the same forward pass.
    def ref_head(x, p, softmax):
        w1, b1, w2, b2, w3, b3 = p
        h = jnp.mean(x, axis=1)
        h = jnp.maximum(h @ w1 + b1, 0.0)
        h = jnp.maximum(h @ w2 + b2, 0.0)
        y = h @ w3 + b3
        return jax.nn.softmax(y, axis=1) if softmax else y

    probs_ref = ref_head(embeddings, params["actor"], True)
    value_ref = ref_head(embeddings, params["critic"], False)

    # Sanity checks (shapes, softmax normalization, closeness to f32 reference;
    # bf16 weights => generous tolerances).
    assert probs.shape == (B, NUM_OUTPUTS)
    assert value.shape == (B, 1)
    assert bool(jnp.allclose(jnp.sum(probs, axis=1), 1.0, atol=1e-3))
    assert bool(jnp.allclose(probs, probs_ref, atol=5e-2, rtol=5e-2))
    assert bool(jnp.allclose(value, value_ref, atol=5e-2, rtol=5e-2))

    print("KERNEL_OK")
</pallas_src>

<mosaic_0001>
module attributes {stable_mosaic.version = 11 : i64} {
  func.func @_mlp_head_kernel(%arg0: i32, %arg1: i32, %arg2: memref<2x8x32xf32, #tpu.memory_space<vmem>>, %arg3: memref<32x384xbf16, #tpu.memory_space<vmem>>, %arg4: memref<1x384xf32, #tpu.memory_space<vmem>>, %arg5: memref<384x384xbf16, #tpu.memory_space<vmem>>, %arg6: memref<1x384xf32, #tpu.memory_space<vmem>>, %arg7: memref<384x128xbf16, #tpu.memory_space<vmem>>, %arg8: memref<1x128xf32, #tpu.memory_space<vmem>>, %arg9: memref<2x128xf32, #tpu.memory_space<vmem>>, %arg10: memref<2x32xf32, #tpu.memory_space<vmem>>) attributes {dimension_semantics = [#tpu.dimension_semantics<parallel>, #tpu.dimension_semantics<arbitrary>], iteration_bounds = array<i64: 1, 1>, scalar_prefetch = 0 : i64, scratch_operands = 1 : i64, tpu.core_type = #tpu.core_type<tc>, window_params = [{transform_indices = @transform_0, window_bounds = array<i64: 2, 8, 32>}, {pipeline_mode = #tpu.pipeline_mode<synchronous>, transform_indices = @transform_1, window_bounds = array<i64: 32, 384>}, {pipeline_mode = #tpu.pipeline_mode<synchronous>, transform_indices = @transform_2, window_bounds = array<i64: 1, 384>}, {pipeline_mode = #tpu.pipeline_mode<synchronous>, transform_indices = @transform_3, window_bounds = array<i64: 384, 384>}, {pipeline_mode = #tpu.pipeline_mode<synchronous>, transform_indices = @transform_4, window_bounds = array<i64: 1, 384>}, {pipeline_mode = #tpu.pipeline_mode<synchronous>, transform_indices = @transform_5, window_bounds = array<i64: 384, 128>}, {pipeline_mode = #tpu.pipeline_mode<synchronous>, transform_indices = @transform_6, window_bounds = array<i64: 1, 128>}, {transform_indices = @transform_7, window_bounds = array<i64: 2, 128>}]} {
    %c0_i32 = arith.constant 0 : i32
    %0 = arith.cmpi eq, %arg1, %c0_i32 : i32
    %1 = arith.extui %0 : i1 to i32
    %c0_i32_0 = arith.constant 0 : i32
    %2 = arith.cmpi ne, %1, %c0_i32_0 : i32
    scf.if %2 {
      %cst_9 = arith.constant 0.000000e+00 : f32
      %11 = vector.broadcast %cst_9 : f32 to vector<2x32xf32>
      %c0_10 = arith.constant 0 : index
      %c0_11 = arith.constant 0 : index
      %12 = vector.load %arg10[%c0_10, %c0_11] : memref<2x32xf32, #tpu.memory_space<vmem>>, vector<2x32xf32>
      tpu.vector_store %arg10[%c0_10, %c0_11], %11 {strides = array<i32>} : memref<2x32xf32, #tpu.memory_space<vmem>>, vector<2x32xf32>,
    } else {
    }
    %c0 = arith.constant 0 : index
    %c0_1 = arith.constant 0 : index
    %3 = vector.load %arg10[%c0, %c0_1] : memref<2x32xf32, #tpu.memory_space<vmem>>, vector<2x32xf32>
    %c0_2 = arith.constant 0 : index
    %c0_3 = arith.constant 0 : index
    %c0_4 = arith.constant 0 : index
    %4 = vector.load %arg2[%c0_2, %c0_3, %c0_4] : memref<2x8x32xf32, #tpu.memory_space<vmem>>, vector<2x8x32xf32>
    %cst = arith.constant dense<0.000000e+00> : vector<2x32xf32>
    %5 = vector.multi_reduction <add>, %4, %cst [1] : vector<2x8x32xf32> to vector<2x32xf32>
    %6 = arith.addf %3, %5 : vector<2x32xf32>
    %c0_5 = arith.constant 0 : index
    %c0_6 = arith.constant 0 : index
    %7 = vector.load %arg10[%c0_5, %c0_6] : memref<2x32xf32, #tpu.memory_space<vmem>>, vector<2x32xf32>
    tpu.vector_store %arg10[%c0_5, %c0_6], %6 {strides = array<i32>} : memref<2x32xf32, #tpu.memory_space<vmem>>, vector<2x32xf32>,
    %c0_i32_7 = arith.constant 0 : i32
    %8 = arith.cmpi eq, %arg1, %c0_i32_7 : i32
    %9 = arith.extui %8 : i1 to i32
    %c0_i32_8 = arith.constant 0 : i32
    %10 = arith.cmpi ne, %9, %c0_i32_8 : i32
    scf.if %10 {
      %c0_9 = arith.constant 0 : index
      %c0_10 = arith.constant 0 : index
      %11 = vector.load %arg10[%c0_9, %c0_10] : memref<2x32xf32, #tpu.memory_space<vmem>>, vector<2x32xf32>
      %12 = arith.truncf %11 : vector<2x32xf32> to vector<2x32xbf16>
      %c0_11 = arith.constant 0 : index
      %c0_12 = arith.constant 0 : index
      %13 = vector.load %arg3[%c0_11, %c0_12] : memref<32x384xbf16, #tpu.memory_space<vmem>>, vector<32x384xbf16>
      %cst_13 = arith.constant dense<0.000000e+00> : vector<2x384xf32>
      %14 = tpu.matmul %12, %13, %cst_13 {dimension_numbers = #tpu.dot_dimension_numbers<[1], [0], [0], [1], [0, 0, 1, 1], [], []>} : vector<2x32xbf16>, vector<32x384xbf16>, vector<2x384xf32> -> vector<2x384xf32>
      %c0_14 = arith.constant 0 : index
      %c0_15 = arith.constant 0 : index
      %15 = vector.load %arg4[%c0_14, %c0_15] : memref<1x384xf32, #tpu.memory_space<vmem>>, vector<1x384xf32>
      %16 = vector.broadcast %15 : vector<1x384xf32> to vector<2x384xf32>
      %17 = arith.addf %14, %16 : vector<2x384xf32>
      %cst_16 = arith.constant 0.000000e+00 : f32
      %18 = vector.broadcast %cst_16 : f32 to vector<2x384xf32>
      %19 = arith.maximumf %17, %18 : vector<2x384xf32>
      %20 = arith.truncf %19 : vector<2x384xf32> to vector<2x384xbf16>
      %c0_17 = arith.constant 0 : index
      %c0_18 = arith.constant 0 : index
      %21 = vector.load %arg5[%c0_17, %c0_18] : memref<384x384xbf16, #tpu.memory_space<vmem>>, vector<384x384xbf16>
      %cst_19 = arith.constant dense<0.000000e+00> : vector<2x384xf32>
      %22 = tpu.matmul %20, %21, %cst_19 {dimension_numbers = #tpu.dot_dimension_numbers<[1], [0], [0], [1], [0, 0, 1, 1], [], []>} : vector<2x384xbf16>, vector<384x384xbf16>, vector<2x384xf32> -> vector<2x384xf32>
      %c0_20 = arith.constant 0 : index
      %c0_21 = arith.constant 0 : index
      %23 = vector.load %arg6[%c0_20, %c0_21] : memref<1x384xf32, #tpu.memory_space<vmem>>, vector<1x384xf32>
      %24 = vector.broadcast %23 : vector<1x384xf32> to vector<2x384xf32>
      %25 = arith.addf %22, %24 : vector<2x384xf32>
      %cst_22 = arith.constant 0.000000e+00 : f32
      %26 = vector.broadcast %cst_22 : f32 to vector<2x384xf32>
      %27 = arith.maximumf %25, %26 : vector<2x384xf32>
      %28 = arith.truncf %27 : vector<2x384xf32> to vector<2x384xbf16>
      %c0_23 = arith.constant 0 : index
      %c0_24 = arith.constant 0 : index
      %29 = vector.load %arg7[%c0_23, %c0_24] : memref<384x128xbf16, #tpu.memory_space<vmem>>, vector<384x128xbf16>
      %cst_25 = arith.constant dense<0.000000e+00> : vector<2x128xf32>
      %30 = tpu.matmul %28, %29, %cst_25 {dimension_numbers = #tpu.dot_dimension_numbers<[1], [0], [0], [1], [0, 0, 1, 1], [], []>} : vector<2x384xbf16>, vector<384x128xbf16>, vector<2x128xf32> -> vector<2x128xf32>
      %c0_26 = arith.constant 0 : index
      %c0_27 = arith.constant 0 : index
      %31 = vector.load %arg8[%c0_26, %c0_27] : memref<1x128xf32, #tpu.memory_space<vmem>>, vector<1x128xf32>
      %32 = vector.broadcast %31 : vector<1x128xf32> to vector<2x128xf32>
      %33 = arith.addf %30, %32 : vector<2x128xf32>
      %34 = tpu.iota {dimensions = array<i32: 1>} : vector<2x128xi32>
      %c6_i32 = arith.constant 6 : i32
      %35 = vector.broadcast %c6_i32 : i32 to vector<2x128xi32>
      %36 = arith.cmpi slt, %34, %35 : vector<2x128xi32>
      %cst_28 = arith.constant -1.000000e+30 : f32
      %37 = vector.broadcast %cst_28 : f32 to vector<2x128xf32>
      %38 = arith.select %36, %33, %37 : vector<2x128xi1>, vector<2x128xf32>
      %cst_29 = arith.constant dense<0xFF800000> : vector<2xf32>
      %39 = vector.multi_reduction <maximumf>, %38, %cst_29 [1] : vector<2x128xf32> to vector<2xf32>
      %40 = vector.shape_cast %39 : vector<2xf32> to vector<2x1xf32>
      %41 = vector.broadcast %40 : vector<2x1xf32> to vector<2x128xf32>
      %42 = arith.subf %38, %41 : vector<2x128xf32>
      %43 = math.exp %42 : vector<2x128xf32>
      %cst_30 = arith.constant dense<0.000000e+00> : vector<2xf32>
      %44 = vector.multi_reduction <add>, %43, %cst_30 [1] : vector<2x128xf32> to vector<2xf32>
      %45 = vector.shape_cast %44 : vector<2xf32> to vector<2x1xf32>
      %46 = vector.broadcast %45 : vector<2x1xf32> to vector<2x128xf32>
      %47 = arith.divf %43, %46 : vector<2x128xf32>
      %c0_31 = arith.constant 0 : index
      %c0_32 = arith.constant 0 : index
      %48 = vector.load %arg9[%c0_31, %c0_32] : memref<2x128xf32, #tpu.memory_space<vmem>>, vector<2x128xf32>
      tpu.vector_store %arg9[%c0_31, %c0_32], %47 {strides = array<i32>} : memref<2x128xf32, #tpu.memory_space<vmem>>, vector<2x128xf32>,
    } else {
    }
    return
  }
  func.func @transform_0(%arg0: i32, %arg1: i32) -> (i32, i32, i32) {
    %c0_i32 = arith.constant 0 : i32
    %c0_i32_0 = arith.constant 0 : i32
    return %arg0, %arg1, %c0_i32 : i32, i32, i32
  }
  func.func @transform_1(%arg0: i32, %arg1: i32) -> (i32, i32) {
    %c0_i32 = arith.constant 0 : i32
    %c0_i32_0 = arith.constant 0 : i32
    %c0_i32_1 = arith.constant 0 : i32
    return %c0_i32, %c0_i32_0 : i32, i32
  }
  func.func @transform_2(%arg0: i32, %arg1: i32) -> (i32, i32) {
    %c0_i32 = arith.constant 0 : i32
    %c0_i32_0 = arith.constant 0 : i32
    %c0_i32_1 = arith.constant 0 : i32
    return %c0_i32, %c0_i32_0 : i32, i32
  }
  func.func @transform_3(%arg0: i32, %arg1: i32) -> (i32, i32) {
    %c0_i32 = arith.constant 0 : i32
    %c0_i32_0 = arith.constant 0 : i32
    %c0_i32_1 = arith.constant 0 : i32
    return %c0_i32, %c0_i32_0 : i32, i32
  }
  func.func @transform_4(%arg0: i32, %arg1: i32) -> (i32, i32) {
    %c0_i32 = arith.constant 0 : i32
    %c0_i32_0 = arith.constant 0 : i32
    %c0_i32_1 = arith.constant 0 : i32
    return %c0_i32, %c0_i32_0 : i32, i32
  }
  func.func @transform_5(%arg0: i32, %arg1: i32) -> (i32, i32) {
    %c0_i32 = arith.constant 0 : i32
    %c0_i32_0 = arith.constant 0 : i32
    %c0_i32_1 = arith.constant 0 : i32
    return %c0_i32, %c0_i32_0 : i32, i32
  }
  func.func @transform_6(%arg0: i32, %arg1: i32) -> (i32, i32) {
    %c0_i32 = arith.constant 0 : i32
    %c0_i32_0 = arith.constant 0 : i32
    %c0_i32_1 = arith.constant 0 : i32
    return %c0_i32, %c0_i32_0 : i32, i32
  }
  func.func @transform_7(%arg0: i32, %arg1: i32) -> (i32, i32) {
    %c0_i32 = arith.constant 0 : i32
    %c0_i32_0 = arith.constant 0 : i32
    return %arg0, %c0_i32 : i32, i32
  }
}

module attributes {stable_mosaic.version = 11 : i64} {
  func.func @_mlp_head_kernel(%arg0: i32, %arg1: i32, %arg2: memref<2x8x32xf32, #tpu.memory_space<vmem>>, %arg3: memref<32x384xbf16, #tpu.memory_space<vmem>>, %arg4: memref<1x384xf32, #tpu.memory_space<vmem>>, %arg5: memref<384x384xbf16, #tpu.memory_space<vmem>>, %arg6: memref<1x384xf32, #tpu.memory_space<vmem>>, %arg7: memref<384x128xbf16, #tpu.memory_space<vmem>>, %arg8: memref<1x128xf32, #tpu.memory_space<vmem>>, %arg9: memref<2x128xf32, #tpu.memory_space<vmem>>, %arg10: memref<2x32xf32, #tpu.memory_space<vmem>>) attributes {dimension_semantics = [#tpu.dimension_semantics<parallel>, #tpu.dimension_semantics<arbitrary>], iteration_bounds = array<i64: 1, 1>, scalar_prefetch = 0 : i64, scratch_operands = 1 : i64, tpu.core_type = #tpu.core_type<tc>, window_params = [{transform_indices = @transform_0, window_bounds = array<i64: 2, 8, 32>}, {pipeline_mode = #tpu.pipeline_mode<synchronous>, transform_indices = @transform_1, window_bounds = array<i64: 32, 384>}, {pipeline_mode = #tpu.pipeline_mode<synchronous>, transform_indices = @transform_2, window_bounds = array<i64: 1, 384>}, {pipeline_mode = #tpu.pipeline_mode<synchronous>, transform_indices = @transform_3, window_bounds = array<i64: 384, 384>}, {pipeline_mode = #tpu.pipeline_mode<synchronous>, transform_indices = @transform_4, window_bounds = array<i64: 1, 384>}, {pipeline_mode = #tpu.pipeline_mode<synchronous>, transform_indices = @transform_5, window_bounds = array<i64: 384, 128>}, {pipeline_mode = #tpu.pipeline_mode<synchronous>, transform_indices = @transform_6, window_bounds = array<i64: 1, 128>}, {transform_indices = @transform_7, window_bounds = array<i64: 2, 128>}]} {
    %c0_i32 = arith.constant 0 : i32
    %0 = arith.cmpi eq, %arg1, %c0_i32 : i32
    %1 = arith.extui %0 : i1 to i32
    %c0_i32_0 = arith.constant 0 : i32
    %2 = arith.cmpi ne, %1, %c0_i32_0 : i32
    scf.if %2 {
      %cst_9 = arith.constant 0.000000e+00 : f32
      %11 = vector.broadcast %cst_9 : f32 to vector<2x32xf32>
      %c0_10 = arith.constant 0 : index
      %c0_11 = arith.constant 0 : index
      %12 = vector.load %arg10[%c0_10, %c0_11] : memref<2x32xf32, #tpu.memory_space<vmem>>, vector<2x32xf32>
      tpu.vector_store %arg10[%c0_10, %c0_11], %11 {strides = array<i32>} : memref<2x32xf32, #tpu.memory_space<vmem>>, vector<2x32xf32>,
    } else {
    }
    %c0 = arith.constant 0 : index
    %c0_1 = arith.constant 0 : index
    %3 = vector.load %arg10[%c0, %c0_1] : memref<2x32xf32, #tpu.memory_space<vmem>>, vector<2x32xf32>
    %c0_2 = arith.constant 0 : index
    %c0_3 = arith.constant 0 : index
    %c0_4 = arith.constant 0 : index
    %4 = vector.load %arg2[%c0_2, %c0_3, %c0_4] : memref<2x8x32xf32, #tpu.memory_space<vmem>>, vector<2x8x32xf32>
    %cst = arith.constant dense<0.000000e+00> : vector<2x32xf32>
    %5 = vector.multi_reduction <add>, %4, %cst [1] : vector<2x8x32xf32> to vector<2x32xf32>
    %6 = arith.addf %3, %5 : vector<2x32xf32>
    %c0_5 = arith.constant 0 : index
    %c0_6 = arith.constant 0 : index
    %7 = vector.load %arg10[%c0_5, %c0_6] : memref<2x32xf32, #tpu.memory_space<vmem>>, vector<2x32xf32>
    tpu.vector_store %arg10[%c0_5, %c0_6], %6 {strides = array<i32>} : memref<2x32xf32, #tpu.memory_space<vmem>>, vector<2x32xf32>,
    %c0_i32_7 = arith.constant 0 : i32
    %8 = arith.cmpi eq, %arg1, %c0_i32_7 : i32
    %9 = arith.extui %8 : i1 to i32
    %c0_i32_8 = arith.constant 0 : i32
    %10 = arith.cmpi ne, %9, %c0_i32_8 : i32
    scf.if %10 {
      %c0_9 = arith.constant 0 : index
      %c0_10 = arith.constant 0 : index
      %11 = vector.load %arg10[%c0_9, %c0_10] : memref<2x32xf32, #tpu.memory_space<vmem>>, vector<2x32xf32>
      %12 = arith.truncf %11 : vector<2x32xf32> to vector<2x32xbf16>
      %c0_11 = arith.constant 0 : index
      %c0_12 = arith.constant 0 : index
      %13 = vector.load %arg3[%c0_11, %c0_12] : memref<32x384xbf16, #tpu.memory_space<vmem>>, vector<32x384xbf16>
      %cst_13 = arith.constant dense<0.000000e+00> : vector<2x384xf32>
      %14 = tpu.matmul %12, %13, %cst_13 {dimension_numbers = #tpu.dot_dimension_numbers<[1], [0], [0], [1], [0, 0, 1, 1], [], []>} : vector<2x32xbf16>, vector<32x384xbf16>, vector<2x384xf32> -> vector<2x384xf32>
      %c0_14 = arith.constant 0 : index
      %c0_15 = arith.constant 0 : index
      %15 = vector.load %arg4[%c0_14, %c0_15] : memref<1x384xf32, #tpu.memory_space<vmem>>, vector<1x384xf32>
      %16 = vector.broadcast %15 : vector<1x384xf32> to vector<2x384xf32>
      %17 = arith.addf %14, %16 : vector<2x384xf32>
      %cst_16 = arith.constant 0.000000e+00 : f32
      %18 = vector.broadcast %cst_16 : f32 to vector<2x384xf32>
      %19 = arith.maximumf %17, %18 : vector<2x384xf32>
      %20 = arith.truncf %19 : vector<2x384xf32> to vector<2x384xbf16>
      %c0_17 = arith.constant 0 : index
      %c0_18 = arith.constant 0 : index
      %21 = vector.load %arg5[%c0_17, %c0_18] : memref<384x384xbf16, #tpu.memory_space<vmem>>, vector<384x384xbf16>
      %cst_19 = arith.constant dense<0.000000e+00> : vector<2x384xf32>
      %22 = tpu.matmul %20, %21, %cst_19 {dimension_numbers = #tpu.dot_dimension_numbers<[1], [0], [0], [1], [0, 0, 1, 1], [], []>} : vector<2x384xbf16>, vector<384x384xbf16>, vector<2x384xf32> -> vector<2x384xf32>
      %c0_20 = arith.constant 0 : index
      %c0_21 = arith.constant 0 : index
      %23 = vector.load %arg6[%c0_20, %c0_21] : memref<1x384xf32, #tpu.memory_space<vmem>>, vector<1x384xf32>
      %24 = vector.broadcast %23 : vector<1x384xf32> to vector<2x384xf32>
      %25 = arith.addf %22, %24 : vector<2x384xf32>
      %cst_22 = arith.constant 0.000000e+00 : f32
      %26 = vector.broadcast %cst_22 : f32 to vector<2x384xf32>
      %27 = arith.maximumf %25, %26 : vector<2x384xf32>
      %28 = arith.truncf %27 : vector<2x384xf32> to vector<2x384xbf16>
      %c0_23 = arith.constant 0 : index
      %c0_24 = arith.constant 0 : index
      %29 = vector.load %arg7[%c0_23, %c0_24] : memref<384x128xbf16, #tpu.memory_space<vmem>>, vector<384x128xbf16>
      %cst_25 = arith.constant dense<0.000000e+00> : vector<2x128xf32>
      %30 = tpu.matmul %28, %29, %cst_25 {dimension_numbers = #tpu.dot_dimension_numbers<[1], [0], [0], [1], [0, 0, 1, 1], [], []>} : vector<2x384xbf16>, vector<384x128xbf16>, vector<2x128xf32> -> vector<2x128xf32>
      %c0_26 = arith.constant 0 : index
      %c0_27 = arith.constant 0 : index
      %31 = vector.load %arg8[%c0_26, %c0_27] : memref<1x128xf32, #tpu.memory_space<vmem>>, vector<1x128xf32>
      %32 = vector.broadcast %31 : vector<1x128xf32> to vector<2x128xf32>
      %33 = arith.addf %30, %32 : vector<2x128xf32>
      %34 = tpu.iota {dimensions = array<i32: 1>} : vector<2x128xi32>
      %c6_i32 = arith.constant 6 : i32
      %35 = vector.broadcast %c6_i32 : i32 to vector<2x128xi32>
      %36 = arith.cmpi slt, %34, %35 : vector<2x128xi32>
      %cst_28 = arith.constant -1.000000e+30 : f32
      %37 = vector.broadcast %cst_28 : f32 to vector<2x128xf32>
      %38 = arith.select %36, %33, %37 : vector<2x128xi1>, vector<2x128xf32>
      %cst_29 = arith.constant dense<0xFF800000> : vector<2xf32>
      %39 = vector.multi_reduction <maximumf>, %38, %cst_29 [1] : vector<2x128xf32> to vector<2xf32>
      %40 = vector.shape_cast %39 : vector<2xf32> to vector<2x1xf32>
      %41 = vector.broadcast %40 : vector<2x1xf32> to vector<2x128xf32>
      %42 = arith.subf %38, %41 : vector<2x128xf32>
      %43 = math.exp %42 : vector<2x128xf32>
      %cst_30 = arith.constant dense<0.000000e+00> : vector<2xf32>
      %44 = vector.multi_reduction <add>, %43, %cst_30 [1] : vector<2x128xf32> to vector<2xf32>
      %45 = vector.shape_cast %44 : vector<2xf32> to vector<2x1xf32>
      %46 = vector.broadcast %45 : vector<2x1xf32> to vector<2x128xf32>
      %47 = arith.divf %43, %46 : vector<2x128xf32>
      %c0_31 = arith.constant 0 : index
      %c0_32 = arith.constant 0 : index
      %48 = vector.load %arg9[%c0_31, %c0_32] : memref<2x128xf32, #tpu.memory_space<vmem>>, vector<2x128xf32>
      tpu.vector_store %arg9[%c0_31, %c0_32], %47 {strides = array<i32>} : memref<2x128xf32, #tpu.memory_space<vmem>>, vector<2x128xf32>,
    } else {
    }
    return
  }
  func.func @transform_0(%arg0: i32, %arg1: i32) -> (i32, i32, i32) {
    %c0_i32 = arith.constant 0 : i32
    %c0_i32_0 = arith.constant 0 : i32
    return %arg0, %arg1, %c0_i32 : i32, i32, i32
  }
  func.func @transform_1(%arg0: i32, %arg1: i32) -> (i32, i32) {
    %c0_i32 = arith.constant 0 : i32
    %c0_i32_0 = arith.constant 0 : i32
    %c0_i32_1 = arith.constant 0 : i32
    return %c0_i32, %c0_i32_0 : i32, i32
  }
  func.func @transform_2(%arg0: i32, %arg1: i32) -> (i32, i32) {
    %c0_i32 = arith.constant 0 : i32
    %c0_i32_0 = arith.constant 0 : i32
    %c0_i32_1 = arith.constant 0 : i32
    return %c0_i32, %c0_i32_0 : i32, i32
  }
  func.func @transform_3(%arg0: i32, %arg1: i32) -> (i32, i32) {
    %c0_i32 = arith.constant 0 : i32
    %c0_i32_0 = arith.constant 0 : i32
    %c0_i32_1 = arith.constant 0 : i32
    return %c0_i32, %c0_i32_0 : i32, i32
  }
  func.func @transform_4(%arg0: i32, %arg1: i32) -> (i32, i32) {
    %c0_i32 = arith.constant 0 : i32
    %c0_i32_0 = arith.constant 0 : i32
    %c0_i32_1 = arith.constant 0 : i32
    return %c0_i32, %c0_i32_0 : i32, i32
  }
  func.func @transform_5(%arg0: i32, %arg1: i32) -> (i32, i32) {
    %c0_i32 = arith.constant 0 : i32
    %c0_i32_0 = arith.constant 0 : i32
    %c0_i32_1 = arith.constant 0 : i32
    return %c0_i32, %c0_i32_0 : i32, i32
  }
  func.func @transform_6(%arg0: i32, %arg1: i32) -> (i32, i32) {
    %c0_i32 = arith.constant 0 : i32
    %c0_i32_0 = arith.constant 0 : i32
    %c0_i32_1 = arith.constant 0 : i32
    return %c0_i32, %c0_i32_0 : i32, i32
  }
  func.func @transform_7(%arg0: i32, %arg1: i32) -> (i32, i32) {
    %c0_i32 = arith.constant 0 : i32
    %c0_i32_0 = arith.constant 0 : i32
    return %arg0, %c0_i32 : i32, i32
  }
}

</mosaic_0001>

<bundles_post_ra>
// kernel: tpu_custom_call.1
= control target key start
LH: loop header
LB: loop body
LE: loop exit
PB: predicated region body
PF: predicated region fallthrough
CT: control target
= control target key end

     0   :  { %12 = vsyncpa [#allocation4], 0  ;;  %s1900_s0 = inlined_call_operand.hbm [shape: f32[2,8,32], index: 0, kind: input, shape index: {}]   ;;  %s1901_s1 = inlined_call_operand.hbm [shape: bf16[32,384], index: 1, kind: input, shape index: {}]   ;;  %s1902_s2 = inlined_call_operand.hbm [shape: f32[1,384], index: 2, kind: input, shape index: {}]   ;;  %s1903_s3 = inlined_call_operand.hbm [shape: bf16[384,384], index: 3, kind: input, shape index: {}]   ;;  %s1904_s4 = inlined_call_operand.vmem [shape: f32[1,384], index: 4, kind: input, shape index: {}]   ;;  %s1905_s5 = inlined_call_operand.hbm [shape: bf16[384,128], index: 5, kind: input, shape index: {}]   ;;  %s1906_s6 = inlined_call_operand.vmem [shape: f32[1,128], index: 6, kind: input, shape index: {}]   ;;  %s1907_s7 = inlined_call_operand.hbm [shape: f32[2,128], index: 7, kind: output, shape index: {}]  }
   0x1   :  { %13 = vsyncpa [#allocation7], 0 }
   0x2   :  { %14 = vsyncpa [#allocation10], 0  ;;  %s33_s26 = sshll.u32 %s1901_s1, 4  ;;  %s34_s26 = int_to_ptr.hbm [resolvable:$true] %s33_s26 }
   0x3   :  { %15 = vsyncpa [#allocation5], 0  ;;  %s1815_s27 = smov [#allocation6]   ;;  %s57_s8 = sshll.u32 %s1903_s3, 4  ;;  %s58_s8 = int_to_ptr.hbm [resolvable:$true] %s57_s8 }
   0x4   :  { %s35_s28 = sshll.u32 %s1815_s27, 4  ;;  %s1816_s9 = smov 192   ;;  %s36_s28 = int_to_ptr.vmem [resolvable:$true] %s35_s28 }
   0x5   :  { %s1817_s10 = smov 12   ;;  %s1818_s11 = smov [#allocation9]  }
   0x6   :  { %41 = dma.hbm_to_vmem [thread:$0]  %s34_s26, 768, %s36_s28, [#allocation7], %s1816_s9, %s1816_s9, %s1817_s10  }
   0x7   :  { %s59_s12 = sshll.u32 %s1818_s11, 4  ;;  %s20_s15 = sshll.u32 %s1900_s0, 4  ;;  %s60_s12 = int_to_ptr.vmem [resolvable:$true] %s59_s12  ;;  %s21_s15 = int_to_ptr.hbm [resolvable:$true] %s20_s15 }
   0x8   :  { %65 = dma.hbm_to_vmem [thread:$0]  %s58_s8, 9216, %s60_s12, [#allocation10], %s1816_s9, %s1816_s9, %s1817_s10  }
   0x9   :  { %s1819_s1 = smov [#allocation3]   ;;  %s47_s3 = sshll.u32 %s1902_s2, 4  ;;  %s48_s3 = int_to_ptr.hbm [resolvable:$true] %s47_s3 }
   0xa   :  { %s22_s16 = sshll.u32 %s1819_s1, 4  ;;  %s1820_s19 = smov 128   ;;  %s23_s16 = int_to_ptr.vmem [resolvable:$true] %s22_s16 }
   0xb   :  { %s1821_s20 = smov 8   ;;  %s1822_s21 = smov [#allocation8]  }
   0xc   :  { %28 = dma.hbm_to_vmem [thread:$0]  %s21_s15, 256, %s23_s16, [#allocation4], %s1820_s19, %s1820_s19, %s1821_s20  }
   0xd   :  { %s49_s22 = sshll.u32 %s1822_s21, 4  ;;  %s72_s0 = sshll.u32 %s1905_s5, 4  ;;  %s50_s22 = int_to_ptr.vmem [resolvable:$true] %s49_s22  ;;  %s73_s0 = int_to_ptr.hbm [resolvable:$true] %s72_s0 }
   0xe   :  { %52 = dma.hbm_to_vmem [thread:$0]  %s48_s3, 48, %s50_s22, [#allocation7]  }
   0xf   :  { %s1823_s25 = smov [#allocation11]   ;;  %s1824_s27 = smov 64  }
  0x10   :  { %s74_s26 = sshll.u32 %s1823_s25, 4  ;;  %s1825_s28 = smov 4   ;;  %s75_s26 = int_to_ptr.vmem [resolvable:$true] %s74_s26 }
  0x11   :  { %80 = dma.hbm_to_vmem [thread:$0]  %s73_s0, 3072, %s75_s26, [#allocation10], %s1824_s27, %s1824_s27, %s1825_s28  }
  0x12   :  { %1807 = dma.done.wait [#allocation4], 256  }
  0x13   :  { %1808 = vsyncadd [#allocation4], 4294967040 }
  0x14   :  { %1809 = dma.done.wait [#allocation7], 816  }
  0x15   :  { %1810 = vsyncadd [#allocation7], 4294966480 }
  0x16   :  { %1811 = dma.done.wait [#allocation10], 12288  }
  0x17   :  { %1812 = vsyncadd [#allocation10], 4294955008  ;;  %vm108_vm0 = vcmask 254976   ;;  %v1826_v0 = vmov 0.0   ;;  %vm113_vm1 = vcmask 261120   ;;  %v111_v19 = vld [vmem:[#allocation3] sm:$0xff] }
  0x18   :  { %109 = vst.msk [vmem:[#allocation2] sm:$0x3] %vm108_vm0, %v1826_v0  ;;  %v1146_v1 = vld [vmem:[#allocation6 + $0x18] sm:$0xf]  ;;  %v1547_v2 = vld [vmem:[#allocation6 + $0x20] sm:$0xf0] }
  0x19   :  { %v1546_v3 = vld [vmem:[#allocation6 + $0x1c] sm:$0xf]  ;;  %v1147_v4 = vor.u32 %v1547_v2, %v1146_v1  ;;  %v1148_v5 = vld [vmem:[#allocation6 + $0x24] sm:$0xf0]  ;;  %v1154_v6 = vld [vmem:[#allocation6 + $0x20] sm:$0xf] }
  0x1a   :  { %v1548_v7 = vld [vmem:[#allocation6 + $0x28] sm:$0xf0]  ;;  %v1151_v8 = vor.u32 %v1546_v3, %v1148_v5  ;;  %v1134_v10 = vld [vmem:[#allocation6] sm:$0xf]  ;;  %v1543_v12 = vld [vmem:[#allocation6 + $0x4] sm:$0xf] }
  0x1b   :  { %v1155_v9 = vor.u32 %v1548_v7, %v1154_v6  ;;  %v1544_v11 = vld [vmem:[#allocation6 + $0x8] sm:$0xf0]  ;;  %198 = vmatpush.bf16.msra.mxu0 %v1147_v4  ;;  %v1136_v14 = vld [vmem:[#allocation6 + $0xc] sm:$0xf0]  ;;  %v1142_v15 = vld [vmem:[#allocation6 + $0x8] sm:$0xf] }
  0x1c   :  { %v1135_v13 = vor.u32 %v1544_v11, %v1134_v10  ;;  %v1545_v16 = vld [vmem:[#allocation6 + $0x10] sm:$0xf0]  ;;  %211 = vmatpush.bf16.msra.mxu1 %v1151_v8  ;;  %v1139_v17 = vor.u32 %v1543_v12, %v1136_v14  ;;  %v112_v20 = vld [vmem:[#allocation3 + $0x8] sm:$0xff]  ;;  %v114_v21 = vsel %vm113_vm1, %v111_v19, 0.0  ;;  %v1571_v24 = vld [vmem:[#allocation9 + $0xb0] sm:$0xf0] }
  0x1d   :  { %224 = vmatpush.bf16.msra.mxu2 %v1155_v9  ;;  %v1143_v18 = vor.u32 %v1545_v16, %v1142_v15  ;;  %v121_v22 = vsel %vm113_vm1, %v112_v20, 0.0  ;;  %v1245_v23 = vld [vmem:[#allocation9 + $0xa8] sm:$0xf]  ;;  %v115_v25 = vrot.slane %v114_v21, 4  ;;  %v1233_v28 = vld [vmem:[#allocation9 + $0x90] sm:$0xf] }
  0x1e   :  { %v122_v26 = vrot.slane %v121_v22, 4  ;;  %v1246_v27 = vor.u32 %v1571_v24, %v1245_v23  ;;  %v1568_v29 = vld [vmem:[#allocation9 + $0x98] sm:$0xf0]  ;;  %v1341_v32 = vld [vmem:[#allocation9 + $0x168] sm:$0xf]  ;;  %vm130_vm2 = vcmask 1041409  }
  0x1f   :  { %199 = vmatpush.bf16.msra.mxu0 %v1135_v13  ;;  %v116_v30 = vadd.f32 %v115_v25, %v114_v21  ;;  %v1595_v33 = vld [vmem:[#allocation9 + $0x170] sm:$0xf0]  ;;  %v1234_v34 = vor.u32 %v1568_v29, %v1233_v28  ;;  %v1221_v35 = vld [vmem:[#allocation9 + $0x78] sm:$0xf]  ;;  %v1570_v37 = vld [vmem:[#allocation9 + $0xac] sm:$0xf] }
  0x20   :  { %212 = vmatpush.bf16.msra.mxu1 %v1139_v17  ;;  %v123_v31 = vadd.f32 %v122_v26, %v121_v22  ;;  %725 = vmatpush.bf16.msra.mxu3 %v1246_v27  ;;  %v1342_v36 = vor.u32 %v1595_v33, %v1341_v32  ;;  %v1247_v38 = vld [vmem:[#allocation9 + $0xb4] sm:$0xf0]  ;;  %v1565_v41 = vld [vmem:[#allocation9 + $0x80] sm:$0xf0]  ;;  %v1329_v43 = vld [vmem:[#allocation9 + $0x150] sm:$0xf] }
  0x21   :  { %225 = vmatpush.bf16.msra.mxu2 %v1143_v18  ;;  %v117_v39 = vrot.slane %v116_v30, 2  ;;  %v1250_v42 = vor.u32 %v1570_v37, %v1247_v38  ;;  %v1592_v44 = vld [vmem:[#allocation9 + $0x158] sm:$0xf0]  ;;  %v1567_v45 = vld [vmem:[#allocation9 + $0x94] sm:$0xf]  ;;  %v1222_v54 = vor.u32 %v1565_v41, %v1221_v35  ;;  %vm1087_vm4 = vcmask 1041408  }
  0x22   :  { %v124_v40 = vrot.slane %v123_v31, 2  ;;  %v1235_v46 = vld [vmem:[#allocation9 + $0x9c] sm:$0xf0]  ;;  %v1330_v50 = vor.u32 %v1592_v44, %v1329_v43  ;;  %v1437_v52 = vld [vmem:[#allocation9 + $0x228] sm:$0xf]  ;;  %s1120_s10 = sshll.u32 %s1907_s7, 4  ;;  %s1121_s10 = int_to_ptr.hbm [resolvable:$true] %s1120_s10 }
  0x23   :  { %738 = vmatpush.bf16.msrb.mxu0 %v1342_v36  ;;  %v118_v47 = vadd.f32 %v117_v39, %v116_v30  ;;  %v1209_v49 = vld [vmem:[#allocation9 + $0x60] sm:$0xf]  ;;  %v1238_v51 = vor.u32 %v1567_v45, %v1235_v46  ;;  %v1619_v53 = vld [vmem:[#allocation9 + $0x230] sm:$0xf0]  ;;  %v1562_v55 = vld [vmem:[#allocation9 + $0x68] sm:$0xf0] }
  0x24   :  { %v125_v48 = vadd.f32 %v124_v40, %v123_v31  ;;  %726 = vmatpush.bf16.msra.mxu3 %v1234_v34  ;;  %v1438_v56 = vor.u32 %v1619_v53, %v1437_v52  ;;  %v1317_v57 = vld [vmem:[#allocation9 + $0x138] sm:$0xf]  ;;  %v1589_v58 = vld [vmem:[#allocation9 + $0x140] sm:$0xf0]  ;;  %v1564_v61 = vld [vmem:[#allocation9 + $0x7c] sm:$0xf]  ;;  %v1210_v9 = vor.u32 %v1562_v55, %v1209_v49 }
  0x25   :  { %764 = vmatpush.bf16.msrb.mxu2 %v1250_v42  ;;  %v119_v59 = vrot.slane %v118_v47, 1  ;;  %v1223_v62 = vld [vmem:[#allocation9 + $0x84] sm:$0xf0]  ;;  %v1318_v63 = vor.u32 %v1589_v58, %v1317_v57  ;;  %v1425_v0 = vld [vmem:[#allocation9 + $0x210] sm:$0xf] }
  0x26   :  { %v126_v60 = vrot.slane %v125_v48, 1  ;;  %751 = vmatpush.bf16.msrb.mxu1 %v1438_v56  ;;  %v1616_v1 = vld [vmem:[#allocation9 + $0x218] sm:$0xf0]  ;;  %v110_v2 = vld [vmem:[#allocation2] sm:$0x3]  ;;  %v1226_v5 = vor.u32 %v1564_v61, %v1223_v62 }
  0x27   :  { %739 = vmatpush.bf16.msrb.mxu0 %v1330_v50  ;;  %v120_v3 = vadd.f32 %v119_v59, %v118_v47  ;;  %v1426_v6 = vor.u32 %v1616_v1, %v1425_v0  ;;  %v1305_v7 = vld [vmem:[#allocation9 + $0x120] sm:$0xf]  ;;  %v1586_v8 = vld [vmem:[#allocation9 + $0x128] sm:$0xf0]  ;;  %v1561_v10 = vld [vmem:[#allocation9 + $0x64] sm:$0xf] }
  0x28   :  { %v127_v4 = vadd.f32 %v126_v60, %v125_v48  ;;  %727 = vmatpush.bf16.msra.mxu3 %v1222_v54  ;;  %v1211_v11 = vld [vmem:[#allocation9 + $0x6c] sm:$0xf0]  ;;  %v1413_v12 = vld [vmem:[#allocation9 + $0x1f8] sm:$0xf]  ;;  %v1197_v14 = vld [vmem:[#allocation9 + $0x48] sm:$0xf]  ;;  %v1306_v18 = vor.u32 %v1586_v8, %v1305_v7 }
  0x29   :  { %765 = vmatpush.bf16.msrb.mxu2 %v1238_v51  ;;  %v1559_v15 = vld [vmem:[#allocation9 + $0x50] sm:$0xf0]  ;;  %v1613_v16 = vld [vmem:[#allocation9 + $0x200] sm:$0xf0]  ;;  %v1293_v20 = vld [vmem:[#allocation9 + $0x108] sm:$0xf]  ;;  %v1214_v21 = vor.u32 %v1561_v10, %v1211_v11 }
  0x2a   :  { %v131_v13 = vsel %vm130_vm2, %v127_v4, %v120_v3  ;;  %752 = vmatpush.bf16.msrb.mxu1 %v1426_v6  ;;  %v1414_v19 = vor.u32 %v1613_v16, %v1413_v12  ;;  %v1583_v22 = vld [vmem:[#allocation9 + $0x110] sm:$0xf0]  ;;  %v1558_v23 = vld [vmem:[#allocation9 + $0x4c] sm:$0xf]  ;;  %v1199_v24 = vld [vmem:[#allocation9 + $0x54] sm:$0xf0]  ;;  %v1198_v25 = vor.u32 %v1559_v15, %v1197_v14 }
  0x2b   :  { %v133_v17 = vadd.f32 %v131_v13, %v110_v2  ;;  %740 = vmatpush.bf16.msrb.mxu0 %v1318_v63  ;;  %v1401_v26 = vld [vmem:[#allocation9 + $0x1e0] sm:$0xf]  ;;  %v1610_v27 = vld [vmem:[#allocation9 + $0x1e8] sm:$0xf0]  ;;  %v1185_v28 = vld [vmem:[#allocation9 + $0x30] sm:$0xf]  ;;  %v1294_v30 = vor.u32 %v1583_v22, %v1293_v20  ;;  %v1202_v32 = vor.u32 %v1558_v23, %v1199_v24 }
  0x2c   :  { %728 = vmatpush.bf16.msra.mxu3 %v1210_v9  ;;  %v1556_v29 = vld [vmem:[#allocation9 + $0x38] sm:$0xf0]  ;;  %v1402_v31 = vor.u32 %v1610_v27, %v1401_v26  ;;  %v1173_v34 = vld [vmem:[#allocation9 + $0x18] sm:$0xf]  ;;  %v1281_v35 = vld [vmem:[#allocation9 + $0xf0] sm:$0xf] }
  0x2d   :  { %766 = vmatpush.bf16.msrb.mxu2 %v1226_v5  ;;  %135 = vst.msk [vmem:[#allocation2] sm:$0x3] %vm108_vm0, %v133_v17  ;;  %v1186_v33 = vor.u32 %v1556_v29, %v1185_v28  ;;  %v1580_v36 = vld [vmem:[#allocation9 + $0xf8] sm:$0xf0]  ;;  %v1553_v37 = vld [vmem:[#allocation9 + $0x20] sm:$0xf0] }
  0x2e   :  { %753 = vmatpush.bf16.msrb.mxu1 %v1414_v19  ;;  %v1555_v38 = vld [vmem:[#allocation9 + $0x34] sm:$0xf]  ;;  %v1187_v39 = vld [vmem:[#allocation9 + $0x3c] sm:$0xf0]  ;;  %v1389_v40 = vld [vmem:[#allocation9 + $0x1c8] sm:$0xf]  ;;  %v1282_v44 = vor.u32 %v1580_v36, %v1281_v35  ;;  %v1174_v46 = vor.u32 %v1553_v37, %v1173_v34 }
  0x2f   :  { %741 = vmatpush.bf16.msrb.mxu0 %v1306_v18  ;;  %v1607_v41 = vld [vmem:[#allocation9 + $0x1d0] sm:$0xf0]  ;;  %v1161_v43 = vld [vmem:[#allocation9] sm:$0xf]  ;;  %v1550_v47 = vld [vmem:[#allocation9 + $0x8] sm:$0xf0]  ;;  %v1190_v48 = vor.u32 %v1555_v38, %v1187_v39 }
  0x30   :  { %729 = vmatpush.bf16.msra.mxu3 %v1198_v25  ;;  %v1269_v49 = vld [vmem:[#allocation9 + $0xd8] sm:$0xf]  ;;  %v1577_v50 = vld [vmem:[#allocation9 + $0xe0] sm:$0xf0]  ;;  %v1594_v51 = vld [vmem:[#allocation9 + $0x16c] sm:$0xf]  ;;  %v1390_v52 = vor.u32 %v1607_v41, %v1389_v40  ;;  %v1162_v59 = vor.u32 %v1550_v47, %v1161_v43 }
  0x31   :  { %767 = vmatpush.bf16.msrb.mxu2 %v1214_v21  ;;  %v1552_v53 = vld [vmem:[#allocation9 + $0x1c] sm:$0xf]  ;;  %v1175_v54 = vld [vmem:[#allocation9 + $0x24] sm:$0xf0]  ;;  %v1343_v55 = vld [vmem:[#allocation9 + $0x174] sm:$0xf0]  ;;  %v1270_v58 = vor.u32 %v1577_v50, %v1269_v49 }
  0x32   :  { %754 = vmatpush.bf16.msrb.mxu1 %v1402_v31  ;;  %v1377_v56 = vld [vmem:[#allocation9 + $0x1b0] sm:$0xf]  ;;  %v1604_v57 = vld [vmem:[#allocation9 + $0x1b8] sm:$0xf0]  ;;  %v1591_v60 = vld [vmem:[#allocation9 + $0x154] sm:$0xf]  ;;  %v1178_v61 = vor.u32 %v1552_v53, %v1175_v54  ;;  %v1346_v1 = vor.u32 %v1594_v51, %v1343_v55 }
  0x33   :  { %742 = vmatpush.bf16.msrb.mxu0 %v1294_v30  ;;  %v1257_v62 = vld [vmem:[#allocation9 + $0xc0] sm:$0xf]  ;;  %v1574_v63 = vld [vmem:[#allocation9 + $0xc8] sm:$0xf0]  ;;  %v1549_v0 = vld [vmem:[#allocation9 + $0x4] sm:$0xf]  ;;  %v1378_v2 = vor.u32 %v1604_v57, %v1377_v56 }
  0x34   :  { %v139_v42 = vld [vmem:[#allocation2] sm:$0x3]  ;;  %730 = vmatpush.bf16.msra.mxu3 %v1186_v33  ;;  %v1163_v3 = vld [vmem:[#allocation9 + $0xc] sm:$0xf0]  ;;  %v1618_v4 = vld [vmem:[#allocation9 + $0x22c] sm:$0xf]  ;;  %v1258_v9 = vor.u32 %v1574_v63, %v1257_v62 }
  0x35   :  { %768 = vmatpush.bf16.msrb.mxu2 %v1202_v32  ;;  %v140_v45 = vpack.c.bf16 %v139_v42, %v139_v42  ;;  %v1439_v5 = vld [vmem:[#allocation9 + $0x234] sm:$0xf0]  ;;  %v1331_v6 = vld [vmem:[#allocation9 + $0x15c] sm:$0xf0]  ;;  %v1349_v7 = vld [vmem:[#allocation9 + $0x170] sm:$0xf]  ;;  %v1166_v12 = vor.u32 %v1549_v0, %v1163_v3 }
  0x36   :  { %755 = vmatpush.bf16.msrb.mxu1 %v1390_v52  ;;  %v1596_v8 = vld [vmem:[#allocation9 + $0x178] sm:$0xf0]  ;;  %v1365_v10 = vld [vmem:[#allocation9 + $0x198] sm:$0xf]  ;;  %v1601_v11 = vld [vmem:[#allocation9 + $0x1a0] sm:$0xf0]  ;;  %v1442_v13 = vor.u32 %v1618_v4, %v1439_v5  ;;  %v1334_v14 = vor.u32 %v1591_v60, %v1331_v6 }
  0x37   :  { %1156 = vmatmul.msk.bf16.vlgmr.msra.gmra.mxu0 %vm113_vm1, %v140_v45  ;;  %1157 = vmatmul.msk.bf16.vlgmr.msra.gmra.mxu1 %vm113_vm1, %v140_v45  ;;  %v1588_v15 = vld [vmem:[#allocation9 + $0x13c] sm:$0xf]  ;;  %v1350_v16 = vor.u32 %v1596_v8, %v1349_v7  ;;  %v1615_v17 = vld [vmem:[#allocation9 + $0x214] sm:$0xf]  ;;  %v1427_v18 = vld [vmem:[#allocation9 + $0x21c] sm:$0xf0]  ;;  %v1366_v20 = vor.u32 %v1601_v11, %v1365_v10 }
  0x38   :  { %1158 = vmatmul.msk.bf16.vlgmr.msra.gmra.mxu2 %vm113_vm1, %v140_v45  ;;  %743 = vmatpush.bf16.msrb.mxu0 %v1282_v44  ;;  %v1319_v19 = vld [vmem:[#allocation9 + $0x144] sm:$0xf0]  ;;  %v1337_v21 = vld [vmem:[#allocation9 + $0x158] sm:$0xf]  ;;  %v1593_v22 = vld [vmem:[#allocation9 + $0x160] sm:$0xf0]  ;;  %v1430_v25 = vor.u32 %v1615_v17, %v1427_v18 }
  0x39   :  { %731 = vmatpush.bf16.msra.mxu3 %v1174_v46  ;;  %769 = vmatpush.bf16.msrb.mxu2 %v1190_v48  ;;  %v1353_v23 = vld [vmem:[#allocation9 + $0x180] sm:$0xf]  ;;  %v1598_v24 = vld [vmem:[#allocation9 + $0x188] sm:$0xf0]  ;;  %v1253_v26 = vld [vmem:[#allocation9 + $0xb0] sm:$0xf]  ;;  %v1322_v28 = vor.u32 %v1588_v15, %v1319_v19  ;;  %v1338_v29 = vor.u32 %v1593_v22, %v1337_v21 }
  0x3a   :  { %756 = vmatpush.bf16.msrb.mxu1 %v1378_v2  ;;  %v1572_v27 = vld [vmem:[#allocation9 + $0xb8] sm:$0xf0]  ;;  %v1585_v30 = vld [vmem:[#allocation9 + $0x124] sm:$0xf]  ;;  %v1307_v31 = vld [vmem:[#allocation9 + $0x12c] sm:$0xf0]  ;;  %v1354_v32 = vor.u32 %v1598_v24, %v1353_v23 }
  0x3b   :  { %v1254_v33 = vor.u32 %v1572_v27, %v1253_v26  ;;  %v1310_v34 = vor.u32 %v1585_v30, %v1307_v31  ;;  %v1582_v35 = vld [vmem:[#allocation9 + $0x10c] sm:$0xf]  ;;  %v1295_v36 = vld [vmem:[#allocation9 + $0x114] sm:$0xf0]  ;;  %v1579_v38 = vld [vmem:[#allocation9 + $0xf4] sm:$0xf] }
  0x3c   :  { %744 = vmatpush.bf16.msrb.mxu0 %v1270_v58  ;;  %v1298_v37 = vor.u32 %v1582_v35, %v1295_v36  ;;  %v1283_v39 = vld [vmem:[#allocation9 + $0xfc] sm:$0xf0]  ;;  %v1612_v41 = vld [vmem:[#allocation9 + $0x1fc] sm:$0xf]  ;;  %v1415_v42 = vld [vmem:[#allocation9 + $0x204] sm:$0xf0] }
  0x3d   :  { %732 = vmatpush.bf16.msra.mxu3 %v1162_v59  ;;  %770 = vmatpush.bf16.msrb.mxu2 %v1178_v61  ;;  %v1286_v40 = vor.u32 %v1579_v38, %v1283_v39  ;;  %v1325_v43 = vld [vmem:[#allocation9 + $0x140] sm:$0xf]  ;;  %v1418_v44 = vor.u32 %v1612_v41, %v1415_v42  ;;  %v1590_v45 = vld [vmem:[#allocation9 + $0x148] sm:$0xf0]  ;;  %v1241_v47 = vld [vmem:[#allocation9 + $0x98] sm:$0xf] }
  0x3e   :  { %757 = vmatpush.bf16.msrb.mxu1 %v1366_v20  ;;  %v1326_v46 = vor.u32 %v1590_v45, %v1325_v43  ;;  %v1569_v48 = vld [vmem:[#allocation9 + $0xa0] sm:$0xf0]  ;;  %v1576_v50 = vld [vmem:[#allocation9 + $0xdc] sm:$0xf]  ;;  %v1271_v51 = vld [vmem:[#allocation9 + $0xe4] sm:$0xf0] }
  0x3f   :  { %v1242_v49 = vor.u32 %v1569_v48, %v1241_v47  ;;  %v1274_v52 = vor.u32 %v1576_v50, %v1271_v51  ;;  %v1609_v53 = vld [vmem:[#allocation9 + $0x1e4] sm:$0xf]  ;;  %v1403_v54 = vld [vmem:[#allocation9 + $0x1ec] sm:$0xf0]  ;;  %v1313_v55 = vld [vmem:[#allocation9 + $0x128] sm:$0xf] }
  0x40   :  { %745 = vmatpush.bf16.msrb.mxu0 %v1258_v9  ;;  %v1406_v56 = vor.u32 %v1609_v53, %v1403_v54  ;;  %v1587_v57 = vld [vmem:[#allocation9 + $0x130] sm:$0xf0]  ;;  %v1229_v59 = vld [vmem:[#allocation9 + $0x80] sm:$0xf]  ;;  %v1566_v60 = vld [vmem:[#allocation9 + $0x88] sm:$0xf0] }
  0x41   :  { %777 = vmatpush.bf16.msrb.mxu3 %v1346_v1  ;;  %771 = vmatpush.bf16.msrb.mxu2 %v1166_v12  ;;  %v1314_v58 = vor.u32 %v1587_v57, %v1313_v55  ;;  %v1230_v61 = vor.u32 %v1566_v60, %v1229_v59  ;;  %v1573_v62 = vld [vmem:[#allocation9 + $0xc4] sm:$0xf]  ;;  %v1259_v63 = vld [vmem:[#allocation9 + $0xcc] sm:$0xf0]  ;;  %v1606_v1 = vld [vmem:[#allocation9 + $0x1cc] sm:$0xf] }
  0x42   :  { %758 = vmatpush.bf16.msrb.mxu1 %v1354_v32  ;;  %v1262_v0 = vor.u32 %v1573_v62, %v1259_v63  ;;  %v1391_v2 = vld [vmem:[#allocation9 + $0x1d4] sm:$0xf0]  ;;  %v1301_v3 = vld [vmem:[#allocation9 + $0x110] sm:$0xf]  ;;  %v1584_v5 = vld [vmem:[#allocation9 + $0x118] sm:$0xf0] }
  0x43   :  { %v1394_v4 = vor.u32 %v1606_v1, %v1391_v2  ;;  %v1302_v6 = vor.u32 %v1584_v5, %v1301_v3  ;;  %v1217_v7 = vld [vmem:[#allocation9 + $0x68] sm:$0xf]  ;;  %v1563_v8 = vld [vmem:[#allocation9 + $0x70] sm:$0xf0]  ;;  %v1379_v11 = vld [vmem:[#allocation9 + $0x1bc] sm:$0xf0] }
  0x44   :  { %790 = vmatpush.bf16.msra.mxu0 %v1442_v13  ;;  %v1218_v9 = vor.u32 %v1563_v8, %v1217_v7  ;;  %v1603_v10 = vld [vmem:[#allocation9 + $0x1b4] sm:$0xf]  ;;  %v1289_v12 = vld [vmem:[#allocation9 + $0xf8] sm:$0xf]  ;;  %v1560_v17 = vld [vmem:[#allocation9 + $0x58] sm:$0xf0] }
  0x45   :  { %778 = vmatpush.bf16.msrb.mxu3 %v1334_v14  ;;  %816 = vmatpush.bf16.msra.mxu2 %v1350_v16  ;;  %v1382_v13 = vor.u32 %v1603_v10, %v1379_v11  ;;  %v1581_v14 = vld [vmem:[#allocation9 + $0x100] sm:$0xf0]  ;;  %v1205_v16 = vld [vmem:[#allocation9 + $0x50] sm:$0xf]  ;;  %v1600_v19 = vld [vmem:[#allocation9 + $0x19c] sm:$0xf] }
  0x46   :  { %803 = vmatpush.bf16.msra.mxu1 %v1254_v33  ;;  %v1290_v15 = vor.u32 %v1581_v14, %v1289_v12  ;;  %v1206_v18 = vor.u32 %v1560_v17, %v1205_v16  ;;  %v1367_v20 = vld [vmem:[#allocation9 + $0x1a4] sm:$0xf0]  ;;  %v1277_v21 = vld [vmem:[#allocation9 + $0xe0] sm:$0xf]  ;;  %v1578_v23 = vld [vmem:[#allocation9 + $0xe8] sm:$0xf0] }
  0x47   :  { %v1370_v22 = vor.u32 %v1600_v19, %v1367_v20  ;;  %v1278_v24 = vor.u32 %v1578_v23, %v1277_v21  ;;  %v1557_v26 = vld [vmem:[#allocation9 + $0x40] sm:$0xf0]  ;;  %v1265_v30 = vld [vmem:[#allocation9 + $0xc8] sm:$0xf]  ;;  %v1575_v31 = vld [vmem:[#allocation9 + $0xd0] sm:$0xf0] }
  0x48   :  { %791 = vmatpush.bf16.msra.mxu0 %v1430_v25  ;;  %v1193_v25 = vld [vmem:[#allocation9 + $0x38] sm:$0xf]  ;;  %v1597_v27 = vld [vmem:[#allocation9 + $0x184] sm:$0xf]  ;;  %v1266_v33 = vor.u32 %v1575_v31, %v1265_v30  ;;  %v1554_v35 = vld [vmem:[#allocation9 + $0x28] sm:$0xf0] }
  0x49   :  { %779 = vmatpush.bf16.msrb.mxu3 %v1322_v28  ;;  %817 = vmatpush.bf16.msra.mxu2 %v1338_v29  ;;  %v1194_v28 = vor.u32 %v1557_v26, %v1193_v25  ;;  %v1355_v29 = vld [vmem:[#allocation9 + $0x18c] sm:$0xf0]  ;;  %v1551_v38 = vld [vmem:[#allocation9 + $0x10] sm:$0xf0]  ;;  %v1620_v48 = vld [vmem:[#allocation9 + $0x238] sm:$0xf0] }
  0x4a   :  { %804 = vmatpush.bf16.msra.mxu1 %v1242_v49  ;;  %v1358_v32 = vor.u32 %v1597_v27, %v1355_v29  ;;  %v1445_v47 = vld [vmem:[#allocation9 + $0x230] sm:$0xf]  ;;  %v1433_v55 = vld [vmem:[#allocation9 + $0x218] sm:$0xf]  ;;  %v1421_v63 = vld [vmem:[#allocation9 + $0x200] sm:$0xf] }
  0x4b   :  { %v1627_v1 = vld [vmem:[#allocation11 + $0x30] sm:$0xff]  ;;  %v1409_v5 = vld [vmem:[#allocation9 + $0x1e8] sm:$0xf]  ;;  %v1608_v11 = vld [vmem:[#allocation9 + $0x1d8] sm:$0xf0] }
  0x4c   :  { %792 = vmatpush.bf16.msra.mxu0 %v1418_v44  ;;  %v1626_v7 = vld [vmem:[#allocation11 + $0x28] sm:$0xff]  ;;  %v1397_v10 = vld [vmem:[#allocation9 + $0x1d0] sm:$0xf]  ;;  %v1625_v12 = vld [vmem:[#allocation11 + $0x20] sm:$0xff] }
  0x4d   :  { %780 = vmatpush.bf16.msrb.mxu3 %v1310_v34  ;;  %818 = vmatpush.bf16.msra.mxu2 %v1326_v46  ;;  %v1181_v34 = vld [vmem:[#allocation9 + $0x20] sm:$0xf]  ;;  %v1385_v14 = vld [vmem:[#allocation9 + $0x1b8] sm:$0xf]  ;;  %v1361_v20 = vld [vmem:[#allocation9 + $0x188] sm:$0xf] }
  0x4e   :  { %805 = vmatpush.bf16.msra.mxu1 %v1230_v61  ;;  %v1182_v36 = vor.u32 %v1554_v35, %v1181_v34  ;;  %v1373_v17 = vld [vmem:[#allocation9 + $0x1a0] sm:$0xf]  ;;  %v1599_v21 = vld [vmem:[#allocation9 + $0x190] sm:$0xf0]  ;;  %v1636_v23 = vld [vmem:[#allocation11 + $0x78] sm:$0xff] }
  0x4f   :  { %v1635_v25 = vld [vmem:[#allocation11 + $0x70] sm:$0xff]  ;;  %v1634_v27 = vld [vmem:[#allocation11 + $0x68] sm:$0xff]  ;;  %v1633_v29 = vld [vmem:[#allocation11 + $0x60] sm:$0xff] }
  0x50   :  { %793 = vmatpush.bf16.msra.mxu0 %v1406_v56  ;;  %v1617_v56 = vld [vmem:[#allocation9 + $0x220] sm:$0xf0]  ;;  %v1623_v26 = vld [vmem:[#allocation11 + $0x10] sm:$0xff]  ;;  %v1644_v31 = vld [vmem:[#allocation11 + $0xb8] sm:$0xff] }
  0x51   :  { %781 = vmatpush.bf16.msrb.mxu3 %v1298_v37  ;;  %819 = vmatpush.bf16.msra.mxu2 %v1314_v58  ;;  %v1169_v37 = vld [vmem:[#allocation9 + $0x8] sm:$0xf]  ;;  %v1628_v58 = vld [vmem:[#allocation11 + $0x38] sm:$0xff]  ;;  %v1434_v61 = vor.u32 %v1617_v56, %v1433_v55  ;;  %v1621_v30 = vld [vmem:[#allocation11] sm:$0xff] }
  0x52   :  { %806 = vmatpush.bf16.msra.mxu1 %v1218_v9  ;;  %v1170_v39 = vor.u32 %v1551_v38, %v1169_v37  ;;  %v1631_v34 = vld [vmem:[#allocation11 + $0x50] sm:$0xff]  ;;  %v1642_v35 = vld [vmem:[#allocation11 + $0xa8] sm:$0xff]  ;;  %v1641_v37 = vld [vmem:[#allocation11 + $0xa0] sm:$0xff] }
  0x53   :  { %v1629_v38 = vld [vmem:[#allocation11 + $0x40] sm:$0xff] }
  0x54   :  { %794 = vmatpush.bf16.msra.mxu0 %v1394_v4 }
  0x55   :  { %782 = vmatpush.bf16.msrb.mxu3 %v1286_v40  ;;  %820 = vmatpush.bf16.msra.mxu2 %v1302_v6  ;;  %v149_v40 = vld [vmem:[#allocation8] sm:$0x7]  ;;  %v1611_v6 = vld [vmem:[#allocation9 + $0x1f0] sm:$0xf0] }
  0x56   :  { %807 = vmatpush.bf16.msra.mxu1 %v1206_v18  ;;  %v151_v41 = vperm.slane %v149_v40, 0  ;;  %v152_v42 = vperm.slane %v149_v40, 1  ;;  %v153_v51 = vperm.slane %v149_v40, 2  ;;  %v1410_v9 = vor.u32 %v1611_v6, %v1409_v5  ;;  %v1602_v18 = vld [vmem:[#allocation9 + $0x1a8] sm:$0xf0]  ;;  %v1639_v40 = vld [vmem:[#allocation11 + $0x90] sm:$0xff] }
  0x57   :  { %v1374_v19 = vor.u32 %v1602_v18, %v1373_v17 }
  0x58   :  { %795 = vmatpush.bf16.msra.mxu0 %v1382_v13  ;;  %v1398_v13 = vor.u32 %v1608_v11, %v1397_v10 }
  0x59   :  { %783 = vmatpush.bf16.msrb.mxu3 %v1274_v52  ;;  %821 = vmatpush.bf16.msra.mxu2 %v1290_v15  ;;  %v1446_v52 = vor.u32 %v1620_v48, %v1445_v47  ;;  %v1605_v15 = vld [vmem:[#allocation9 + $0x1c0] sm:$0xf0] }
  0x5a   :  { %808 = vmatpush.bf16.msra.mxu1 %v1194_v28  ;;  %v1386_v16 = vor.u32 %v1605_v15, %v1385_v14  ;;  %v1622_v28 = vld [vmem:[#allocation11 + $0x8] sm:$0xff] }
  0x5c   :  { %796 = vmatpush.bf16.msra.mxu0 %v1370_v22  ;;  %v1362_v22 = vor.u32 %v1599_v21, %v1361_v20  ;;  %v1083_v20 = vlaneseq  ;;  %v1658_v21 = vld [vmem:[%s1906_s6] ss:$0 sm:$0xff]  ;;  %s1827_s6 = smov [#allocation12]  }
  0x5d   :  { %784 = vmatpush.bf16.msrb.mxu3 %v1262_v0  ;;  %822 = vmatpush.bf16.msra.mxu2 %v1278_v24  ;;  %v1614_v0 = vld [vmem:[#allocation9 + $0x208] sm:$0xf0]  ;;  %v1624_v24 = vld [vmem:[#allocation11 + $0x18] sm:$0xff]  ;;  %s1118_s30 = sshll.u32 %s1827_s6, 4  ;;  %s1119_s30 = int_to_ptr.vmem [resolvable:$true] %s1118_s30 }
  0x5e   :  { %809 = vmatpush.bf16.msra.mxu1 %v1182_v36  ;;  %v1422_v4 = vor.u32 %v1614_v0, %v1421_v63  ;;  %v1630_v36 = vld [vmem:[#allocation11 + $0x48] sm:$0xff] }
  0x60   :  { %797 = vmatpush.bf16.msra.mxu0 %v1358_v32  ;;  %v1632_v32 = vld [vmem:[#allocation11 + $0x58] sm:$0xff] }
  0x61   :  { %823 = vmatpush.bf16.msra.mxu2 %v1266_v33  ;;  %v1643_v33 = vld [vmem:[#allocation11 + $0xb0] sm:$0xff] }
  0x62   :  { %810 = vmatpush.bf16.msra.mxu1 %v1170_v39  ;;  %v1640_v39 = vld [vmem:[#allocation11 + $0x98] sm:$0xff] }
  0xb4   :  { %v201_v43 = vpop.f32.mrf.mxu0  ;;  %v214_v44 = vpop.f32.mrf.mxu1 }
  0xb5   :  { %v202_v45 = vadd.f32 %v201_v43, %v151_v41  ;;  %v215_v46 = vadd.f32 %v214_v44, %v152_v42  ;;  %v333_v42 = vld [vmem:[%s1904_s4] sm:$0x7]  ;;  %v1638_v44 = vld [vmem:[#allocation11 + $0x88] sm:$0xff] }
  0xb6   :  { %v335_v43 = vperm.slane %v333_v42, 0  ;;  %v337_v5 = vperm.slane %v333_v42, 2 }
  0xb7   :  { %v231_v49 = vmax.f32 %v202_v45, 0.0  ;;  %v232_v50 = vmax.f32 %v215_v46, 0.0 }
  0xb9   :  { %v234_v53 = vpack.c.bf16 %v231_v49, %v231_v49  ;;  %v235_v54 = vpack.c.bf16 %v232_v50, %v232_v50 }
  0xbb   :  { %v227_v57 = vpop.f32.mrf.mxu2  ;;  %733 = vmatmul.bf16.vlgmr.msra.gmra.mxu3 %v234_v53  ;;  %746 = vmatmul.bf16.vlgmr.msrb.gmra.mxu0 %v235_v54 }
  0xbc   :  { %v228_v59 = vadd.f32 %v227_v57, %v153_v51  ;;  %772 = vmatmul.bf16.vlgmr.msrb.gmra.mxu2 %v234_v53  ;;  %v203_v60 = vpop.f32.mrf.mxu0  ;;  %829 = vmatpush.bf16.msra.mxu3 %v1446_v52  ;;  %v216_v62 = vpop.f32.mrf.mxu1  ;;  %v1637_v51 = vld [vmem:[#allocation11 + $0x80] sm:$0xff] }
  0xbd   :  { %1044 = vmatpush.bf16.msrb.mxu0 %v1628_v58  ;;  %1070 = vmatpush.bf16.msrb.mxu2 %v1644_v31 }
  0xbe   :  { %v233_v2 = vmax.f32 %v228_v59, 0.0  ;;  %v336_v59 = vperm.slane %v333_v42, 1 }
  0xc0   :  { %v236_v3 = vpack.c.bf16 %v233_v2, %v233_v2  ;;  %830 = vmatpush.bf16.msra.mxu3 %v1434_v61 }
  0xc1   :  { %1045 = vmatpush.bf16.msrb.mxu0 %v1627_v1  ;;  %1071 = vmatpush.bf16.msrb.mxu2 %v1643_v33 }
  0xc2   :  { %759 = vmatmul.bf16.vlgmr.msrb.gmra.mxu1 %v236_v3 }
  0xc3   :  { %v229_v8 = vpop.f32.mrf.mxu2  ;;  %1057 = vmatpush.bf16.msrb.mxu1 %v1636_v23 }
  0xc4   :  { %831 = vmatpush.bf16.msra.mxu3 %v1422_v4 }
  0xc5   :  { %1046 = vmatpush.bf16.msrb.mxu0 %v1626_v7  ;;  %1072 = vmatpush.bf16.msrb.mxu2 %v1642_v35 }
  0xc7   :  { %1058 = vmatpush.bf16.msrb.mxu1 %v1635_v25 }
  0xc8   :  { %832 = vmatpush.bf16.msra.mxu3 %v1410_v9 }
  0xc9   :  { %1047 = vmatpush.bf16.msrb.mxu0 %v1625_v12  ;;  %1073 = vmatpush.bf16.msrb.mxu2 %v1641_v37 }
  0xcb   :  { %785 = vmatmul.bf16.vlgmr.msrb.gmra.mxu3 %v235_v54  ;;  %798 = vmatmul.bf16.vlgmr.msra.gmra.mxu0 %v236_v3 }
  0xcc   :  { %824 = vmatmul.bf16.vlgmr.msra.gmra.mxu2 %v235_v54  ;;  %833 = vmatpush.bf16.msra.mxu3 %v1398_v13 }
  0xcd   :  { %1048 = vmatpush.bf16.msrb.mxu0 %v1624_v24  ;;  %1059 = vmatpush.bf16.msrb.mxu1 %v1634_v27 }
  0xce   :  { %1074 = vmatpush.bf16.msrb.mxu2 %v1640_v39 }
  0xd0   :  { %834 = vmatpush.bf16.msra.mxu3 %v1386_v16 }
  0xd1   :  { %1049 = vmatpush.bf16.msrb.mxu0 %v1623_v26  ;;  %1060 = vmatpush.bf16.msrb.mxu1 %v1633_v29 }
  0xd2   :  { %811 = vmatmul.bf16.vlgmr.msra.gmra.mxu1 %v234_v53  ;;  %1075 = vmatpush.bf16.msrb.mxu2 %v1639_v40 }
  0xd4   :  { %835 = vmatpush.bf16.msra.mxu3 %v1374_v19 }
  0xd5   :  { %1050 = vmatpush.bf16.msrb.mxu0 %v1622_v28  ;;  %1061 = vmatpush.bf16.msrb.mxu1 %v1632_v32 }
  0xd6   :  { %1076 = vmatpush.bf16.msrb.mxu2 %v1638_v44 }
  0xd8   :  { %836 = vmatpush.bf16.msra.mxu3 %v1362_v22  ;;  %v1084_v22 = vand.u32 127, %v1083_v20 }
  0xd9   :  { %1051 = vmatpush.bf16.msrb.mxu0 %v1621_v30  ;;  %1062 = vmatpush.bf16.msrb.mxu1 %v1631_v34 }
  0xda   :  { %1077 = vmatpush.bf16.msrb.mxu2 %v1637_v51  ;;  %vm1085_vm3 = vcmp.lt.s32.totalorder %v1084_v22, 6 }
  0xdb   :  { %837 = vmatmul.bf16.vlgmr.msra.gmra.mxu3 %v236_v3 }
  0xdd   :  { %1063 = vmatpush.bf16.msrb.mxu1 %v1630_v36 }
  0xe1   :  { %1064 = vmatpush.bf16.msrb.mxu1 %v1629_v38 }
 0x138   :  { %v747_v41 = vpop.f32.mrf.mxu0 }
 0x13e   :  { %v734_v45 = vpop.f32.mrf.mxu3 }
 0x13f   :  { %v735_v46 = vadd.f32 %v734_v45, %v335_v43  ;;  %v760_v47 = vpop.f32.mrf.mxu1  ;;  %v773_v48 = vpop.f32.mrf.mxu2 }
 0x140   :  { %v749_v49 = vpop.f32.mrf.mxu0  ;;  %v774_v60 = vadd.f32 %v773_v48, %v336_v59 }
 0x141   :  { %v748_v50 = vadd.f32 %v747_v41, %v735_v46 }
 0x143   :  { %v761_v52 = vadd.f32 %v760_v47, %v748_v50 }
 0x145   :  { %v842_v53 = vmax.f32 %v761_v52, 0.0 }
 0x146   :  { %v736_v54 = vpop.f32.mrf.mxu3 }
 0x147   :  { %v845_v55 = vpack.c.bf16 %v842_v53, %v842_v53  ;;  %v762_v56 = vpop.f32.mrf.mxu1  ;;  %v775_v57 = vpop.f32.mrf.mxu2 }
 0x148   :  { %v799_v58 = vpop.f32.mrf.mxu0 }
 0x149   :  { %1052 = vmatmul.bf16.vlgmr.msrb.gmra.mxu0 %v845_v55 }
 0x14e   :  { %v786_v61 = vpop.f32.mrf.mxu3 }
 0x14f   :  { %v787_v62 = vadd.f32 %v786_v61, %v774_v60  ;;  %v812_v63 = vpop.f32.mrf.mxu1  ;;  %v825_v0 = vpop.f32.mrf.mxu2 }
 0x150   :  { %v801_v1 = vpop.f32.mrf.mxu0  ;;  %v813_v9 = vadd.f32 %v812_v63, %v337_v5 }
 0x151   :  { %v800_v2 = vadd.f32 %v799_v58, %v787_v62 }
 0x152   :  { %v826_v10 = vadd.f32 %v825_v0, %v813_v9 }
 0x153   :  { %v843_v3 = vmax.f32 %v800_v2, 0.0 }
 0x155   :  { %v846_v4 = vpack.c.bf16 %v843_v3, %v843_v3 }
 0x156   :  { %v788_v6 = vpop.f32.mrf.mxu3 }
 0x157   :  { %v814_v7 = vpop.f32.mrf.mxu1  ;;  %v827_v8 = vpop.f32.mrf.mxu2  ;;  %1065 = vmatmul.bf16.vlgmr.msrb.gmra.mxu1 %v846_v4 }
 0x15e   :  { %v838_v11 = vpop.f32.mrf.mxu3 }
 0x15f   :  { %v839_v12 = vadd.f32 %v838_v11, %v826_v10 }
 0x161   :  { %v844_v13 = vmax.f32 %v839_v12, 0.0 }
 0x163   :  { %v847_v14 = vpack.c.bf16 %v844_v13, %v844_v13 }
 0x165   :  { %1078 = vmatmul.bf16.vlgmr.msrb.gmra.mxu2 %v847_v14 }
 0x166   :  { %v840_v15 = vpop.f32.mrf.mxu3 }
 0x1c6   :  { %v1053_v16 = vpop.f32.mrf.mxu0 }
 0x1c7   :  { %v1054_v23 = vadd.f32 %v1658_v21, %v1053_v16 }
 0x1ce   :  { %v1055_v17 = vpop.f32.mrf.mxu0 }
 0x1d4   :  { %v1066_v18 = vpop.f32.mrf.mxu1 }
 0x1d5   :  { %v1067_v24 = vadd.f32 %v1066_v18, %v1054_v23 }
 0x1dc   :  { %v1068_v19 = vpop.f32.mrf.mxu1 }
 0x1e8   :  { %v1079_v25 = vpop.f32.mrf.mxu2 }
 0x1e9   :  { %v1080_v26 = vadd.f32 %v1079_v25, %v1067_v24 }
 0x1eb   :  { %v1086_v27 = vsel %vm1085_vm3, %v1080_v26, -1e+30 }
 0x1ec   :  { %v1088_v28 = vsel %vm1087_vm4, %v1086_v27, -inf }
 0x1ed   :  { %1089 = vmax.xlane.f32.xlu0 %v1088_v28 }
 0x1f0   :  { %v1081_v29 = vpop.f32.mrf.mxu2 }
 0x260   :  { %v1090_v30 = vpop.xlane.xlu0 %1089 }
 0x261   :  { %v1091_v31 = vsub.f32 %v1086_v27, %v1090_v30 }
 0x263   :  { %v1092_v32 = vmul.f32 1.442695, %v1091_v31 }
 0x265   :  { %1659 = vpow2.f32 %v1092_v32 }
 0x26b   :  { %v1660_v33 = vpop.eup %1659 }
 0x26c   :  { %v1094_v34 = vsel %vm1087_vm4, %v1660_v33, 0.0 }
 0x26d   :  { %1095 = vadd.xlane.f32.xlu0 %v1094_v34 }
 0x2e0   :  { %v1096_v35 = vpop.xlane.xlu0 %1095 }
 0x2e1   :  { %1661 = vrcp.f32 %v1096_v35  ;;  %v1108_v39 = vand.u32 2147483648, %v1096_v35  ;;  %v1106_v41 = vand.u32 2147483647, %v1096_v35  ;;  %vm1102_vm6 = vweird.f32 %v1096_v35 }
 0x2e3   :  { %v1109_v43 = vor.u32 1.1754944e-38, %v1108_v39  ;;  %vm1107_vm8 = vcmp.eq.f32.partialorder %v1106_v41, 8.507059e+37 }
 0x2e7   :  { %v1662_v36 = vpop.eup %1661 }
 0x2e8   :  { %v1098_v37 = vmul.f32 %v1662_v36, %v1096_v35  ;;  %vm1103_vm5 = vweird.f32 %v1662_v36 }
 0x2e9   :  { %vm1104_vm7 = vmor %vm1102_vm6, %vm1103_vm5 }
 0x2ea   :  { %v1099_v38 = vsub.f32 1.0, %v1098_v37 }
 0x2ec   :  { %v1100_v40 = vmul.f32 %v1662_v36, %v1099_v38 }
 0x2ee   :  { %v1101_v42 = vadd.f32 %v1662_v36, %v1100_v40 }
 0x2f0   :  { %v1105_v44 = vsel %vm1104_vm7, %v1662_v36, %v1101_v42 }
 0x2f1   :  { %v1110_v45 = vsel %vm1107_vm8, %v1109_v43, %v1105_v44 }
 0x2f2   :  { %v1111_v46 = vmul.f32 %v1660_v33, %v1110_v45 }
 0x2f4   :  { %1112 = vst [vmem:[#allocation12] sm:$0x3] %v1111_v46 }
 0x2f5   :  { %1123 = dma.vmem_to_hbm [thread:$0]  %s1119_s30, 32, %s1121_s10, [#allocation5]  }
 0x2f6   :  { %1813 = dma.done.wait [#allocation5], 32  }
 0x2f7   :  { %1814 = vsyncadd [#allocation5], 4294967264 }
 0x2f8   :  { %1128 = vsyncpa [#allocation4], 1 }
 0x2f9   :  { %1129 = vsyncpa [#allocation7], 1 }
 0x2fa   :  { %1130 = vsyncpa [#allocation10], 1 }
 0x2fb   :  { %1131 = vsyncpa [#allocation5], 1 }

// kernel: tpu_custom_call.1
= control target key start
LH: loop header
LB: loop body
LE: loop exit
PB: predicated region body
PF: predicated region fallthrough
CT: control target
= control target key end

     0   :  { %12 = vsyncpa [#allocation4], 0  ;;  %s1900_s0 = inlined_call_operand.hbm [shape: f32[2,8,32], index: 0, kind: input, shape index: {}]   ;;  %s1901_s1 = inlined_call_operand.hbm [shape: bf16[32,384], index: 1, kind: input, shape index: {}]   ;;  %s1902_s2 = inlined_call_operand.hbm [shape: f32[1,384], index: 2, kind: input, shape index: {}]   ;;  %s1903_s3 = inlined_call_operand.hbm [shape: bf16[384,384], index: 3, kind: input, shape index: {}]   ;;  %s1904_s4 = inlined_call_operand.vmem [shape: f32[1,384], index: 4, kind: input, shape index: {}]   ;;  %s1905_s5 = inlined_call_operand.hbm [shape: bf16[384,128], index: 5, kind: input, shape index: {}]   ;;  %s1906_s6 = inlined_call_operand.vmem [shape: f32[1,128], index: 6, kind: input, shape index: {}]   ;;  %s1907_s7 = inlined_call_operand.hbm [shape: f32[2,128], index: 7, kind: output, shape index: {}]  }
   0x1   :  { %13 = vsyncpa [#allocation7], 0 }
   0x2   :  { %14 = vsyncpa [#allocation10], 0  ;;  %s33_s26 = sshll.u32 %s1901_s1, 4  ;;  %s34_s26 = int_to_ptr.hbm [resolvable:$true] %s33_s26 }
   0x3   :  { %15 = vsyncpa [#allocation5], 0  ;;  %s1815_s27 = smov [#allocation6]   ;;  %s57_s8 = sshll.u32 %s1903_s3, 4  ;;  %s58_s8 = int_to_ptr.hbm [resolvable:$true] %s57_s8 }
   0x4   :  { %s35_s28 = sshll.u32 %s1815_s27, 4  ;;  %s1816_s9 = smov 192   ;;  %s36_s28 = int_to_ptr.vmem [resolvable:$true] %s35_s28 }
   0x5   :  { %s1817_s10 = smov 12   ;;  %s1818_s11 = smov [#allocation9]  }
   0x6   :  { %41 = dma.hbm_to_vmem [thread:$0]  %s34_s26, 768, %s36_s28, [#allocation7], %s1816_s9, %s1816_s9, %s1817_s10  }
   0x7   :  { %s59_s12 = sshll.u32 %s1818_s11, 4  ;;  %s20_s15 = sshll.u32 %s1900_s0, 4  ;;  %s60_s12 = int_to_ptr.vmem [resolvable:$true] %s59_s12  ;;  %s21_s15 = int_to_ptr.hbm [resolvable:$true] %s20_s15 }
   0x8   :  { %65 = dma.hbm_to_vmem [thread:$0]  %s58_s8, 9216, %s60_s12, [#allocation10], %s1816_s9, %s1816_s9, %s1817_s10  }
   0x9   :  { %s1819_s1 = smov [#allocation3]   ;;  %s47_s3 = sshll.u32 %s1902_s2, 4  ;;  %s48_s3 = int_to_ptr.hbm [resolvable:$true] %s47_s3 }
   0xa   :  { %s22_s16 = sshll.u32 %s1819_s1, 4  ;;  %s1820_s19 = smov 128   ;;  %s23_s16 = int_to_ptr.vmem [resolvable:$true] %s22_s16 }
   0xb   :  { %s1821_s20 = smov 8   ;;  %s1822_s21 = smov [#allocation8]  }
   0xc   :  { %28 = dma.hbm_to_vmem [thread:$0]  %s21_s15, 256, %s23_s16, [#allocation4], %s1820_s19, %s1820_s19, %s1821_s20  }
   0xd   :  { %s49_s22 = sshll.u32 %s1822_s21, 4  ;;  %s72_s0 = sshll.u32 %s1905_s5, 4  ;;  %s50_s22 = int_to_ptr.vmem [resolvable:$true] %s49_s22  ;;  %s73_s0 = int_to_ptr.hbm [resolvable:$true] %s72_s0 }
   0xe   :  { %52 = dma.hbm_to_vmem [thread:$0]  %s48_s3, 48, %s50_s22, [#allocation7]  }
   0xf   :  { %s1823_s25 = smov [#allocation11]   ;;  %s1824_s27 = smov 64  }
  0x10   :  { %s74_s26 = sshll.u32 %s1823_s25, 4  ;;  %s1825_s28 = smov 4   ;;  %s75_s26 = int_to_ptr.vmem [resolvable:$true] %s74_s26 }
  0x11   :  { %80 = dma.hbm_to_vmem [thread:$0]  %s73_s0, 3072, %s75_s26, [#allocation10], %s1824_s27, %s1824_s27, %s1825_s28  }
  0x12   :  { %1807 = dma.done.wait [#allocation4], 256  }
  0x13   :  { %1808 = vsyncadd [#allocation4], 4294967040 }
  0x14   :  { %1809 = dma.done.wait [#allocation7], 816  }
  0x15   :  { %1810 = vsyncadd [#allocation7], 4294966480 }
  0x16   :  { %1811 = dma.done.wait [#allocation10], 12288  }
  0x17   :  { %1812 = vsyncadd [#allocation10], 4294955008  ;;  %vm108_vm0 = vcmask 254976   ;;  %v1826_v0 = vmov 0.0   ;;  %vm113_vm1 = vcmask 261120   ;;  %v111_v19 = vld [vmem:[#allocation3] sm:$0xff] }
  0x18   :  { %109 = vst.msk [vmem:[#allocation2] sm:$0x3] %vm108_vm0, %v1826_v0  ;;  %v1146_v1 = vld [vmem:[#allocation6 + $0x18] sm:$0xf]  ;;  %v1547_v2 = vld [vmem:[#allocation6 + $0x20] sm:$0xf0] }
  0x19   :  { %v1546_v3 = vld [vmem:[#allocation6 + $0x1c] sm:$0xf]  ;;  %v1147_v4 = vor.u32 %v1547_v2, %v1146_v1  ;;  %v1148_v5 = vld [vmem:[#allocation6 + $0x24] sm:$0xf0]  ;;  %v1154_v6 = vld [vmem:[#allocation6 + $0x20] sm:$0xf] }
  0x1a   :  { %v1548_v7 = vld [vmem:[#allocation6 + $0x28] sm:$0xf0]  ;;  %v1151_v8 = vor.u32 %v1546_v3, %v1148_v5  ;;  %v1134_v10 = vld [vmem:[#allocation6] sm:$0xf]  ;;  %v1543_v12 = vld [vmem:[#allocation6 + $0x4] sm:$0xf] }
  0x1b   :  { %v1155_v9 = vor.u32 %v1548_v7, %v1154_v6  ;;  %v1544_v11 = vld [vmem:[#allocation6 + $0x8] sm:$0xf0]  ;;  %198 = vmatpush.bf16.msra.mxu0 %v1147_v4  ;;  %v1136_v14 = vld [vmem:[#allocation6 + $0xc] sm:$0xf0]  ;;  %v1142_v15 = vld [vmem:[#allocation6 + $0x8] sm:$0xf] }
  0x1c   :  { %v1135_v13 = vor.u32 %v1544_v11, %v1134_v10  ;;  %v1545_v16 = vld [vmem:[#allocation6 + $0x10] sm:$0xf0]  ;;  %211 = vmatpush.bf16.msra.mxu1 %v1151_v8  ;;  %v1139_v17 = vor.u32 %v1543_v12, %v1136_v14  ;;  %v112_v20 = vld [vmem:[#allocation3 + $0x8] sm:$0xff]  ;;  %v114_v21 = vsel %vm113_vm1, %v111_v19, 0.0  ;;  %v1571_v24 = vld [vmem:[#allocation9 + $0xb0] sm:$0xf0] }
  0x1d   :  { %224 = vmatpush.bf16.msra.mxu2 %v1155_v9  ;;  %v1143_v18 = vor.u32 %v1545_v16, %v1142_v15  ;;  %v121_v22 = vsel %vm113_vm1, %v112_v20, 0.0  ;;  %v1245_v23 = vld [vmem:[#allocation9 + $0xa8] sm:$0xf]  ;;  %v115_v25 = vrot.slane %v114_v21, 4  ;;  %v1233_v28 = vld [vmem:[#allocation9 + $0x90] sm:$0xf] }
  0x1e   :  { %v122_v26 = vrot.slane %v121_v22, 4  ;;  %v1246_v27 = vor.u32 %v1571_v24, %v1245_v23  ;;  %v1568_v29 = vld [vmem:[#allocation9 + $0x98] sm:$0xf0]  ;;  %v1341_v32 = vld [vmem:[#allocation9 + $0x168] sm:$0xf]  ;;  %vm130_vm2 = vcmask 1041409  }
  0x1f   :  { %199 = vmatpush.bf16.msra.mxu0 %v1135_v13  ;;  %v116_v30 = vadd.f32 %v115_v25, %v114_v21  ;;  %v1595_v33 = vld [vmem:[#allocation9 + $0x170] sm:$0xf0]  ;;  %v1234_v34 = vor.u32 %v1568_v29, %v1233_v28  ;;  %v1221_v35 = vld [vmem:[#allocation9 + $0x78] sm:$0xf]  ;;  %v1570_v37 = vld [vmem:[#allocation9 + $0xac] sm:$0xf] }
  0x20   :  { %212 = vmatpush.bf16.msra.mxu1 %v1139_v17  ;;  %v123_v31 = vadd.f32 %v122_v26, %v121_v22  ;;  %725 = vmatpush.bf16.msra.mxu3 %v1246_v27  ;;  %v1342_v36 = vor.u32 %v1595_v33, %v1341_v32  ;;  %v1247_v38 = vld [vmem:[#allocation9 + $0xb4] sm:$0xf0]  ;;  %v1565_v41 = vld [vmem:[#allocation9 + $0x80] sm:$0xf0]  ;;  %v1329_v43 = vld [vmem:[#allocation9 + $0x150] sm:$0xf] }
  0x21   :  { %225 = vmatpush.bf16.msra.mxu2 %v1143_v18  ;;  %v117_v39 = vrot.slane %v116_v30, 2  ;;  %v1250_v42 = vor.u32 %v1570_v37, %v1247_v38  ;;  %v1592_v44 = vld [vmem:[#allocation9 + $0x158] sm:$0xf0]  ;;  %v1567_v45 = vld [vmem:[#allocation9 + $0x94] sm:$0xf]  ;;  %v1222_v54 = vor.u32 %v1565_v41, %v1221_v35  ;;  %vm1087_vm4 = vcmask 1041408  }
  0x22   :  { %v124_v40 = vrot.slane %v123_v31, 2  ;;  %v1235_v46 = vld [vmem:[#allocation9 + $0x9c] sm:$0xf0]  ;;  %v1330_v50 = vor.u32 %v1592_v44, %v1329_v43  ;;  %v1437_v52 = vld [vmem:[#allocation9 + $0x228] sm:$0xf]  ;;  %s1120_s10 = sshll.u32 %s1907_s7, 4  ;;  %s1121_s10 = int_to_ptr.hbm [resolvable:$true] %s1120_s10 }
  0x23   :  { %738 = vmatpush.bf16.msrb.mxu0 %v1342_v36  ;;  %v118_v47 = vadd.f32 %v117_v39, %v116_v30  ;;  %v1209_v49 = vld [vmem:[#allocation9 + $0x60] sm:$0xf]  ;;  %v1238_v51 = vor.u32 %v1567_v45, %v1235_v46  ;;  %v1619_v53 = vld [vmem:[#allocation9 + $0x230] sm:$0xf0]  ;;  %v1562_v55 = vld [vmem:[#allocation9 + $0x68] sm:$0xf0] }
  0x24   :  { %v125_v48 = vadd.f32 %v124_v40, %v123_v31  ;;  %726 = vmatpush.bf16.msra.mxu3 %v1234_v34  ;;  %v1438_v56 = vor.u32 %v1619_v53, %v1437_v52  ;;  %v1317_v57 = vld [vmem:[#allocation9 + $0x138] sm:$0xf]  ;;  %v1589_v58 = vld [vmem:[#allocation9 + $0x140] sm:$0xf0]  ;;  %v1564_v61 = vld [vmem:[#allocation9 + $0x7c] sm:$0xf]  ;;  %v1210_v9 = vor.u32 %v1562_v55, %v1209_v49 }
  0x25   :  { %764 = vmatpush.bf16.msrb.mxu2 %v1250_v42  ;;  %v119_v59 = vrot.slane %v118_v47, 1  ;;  %v1223_v62 = vld [vmem:[#allocation9 + $0x84] sm:$0xf0]  ;;  %v1318_v63 = vor.u32 %v1589_v58, %v1317_v57  ;;  %v1425_v0 = vld [vmem:[#allocation9 + $0x210] sm:$0xf] }
  0x26   :  { %v126_v60 = vrot.slane %v125_v48, 1  ;;  %751 = vmatpush.bf16.msrb.mxu1 %v1438_v56  ;;  %v1616_v1 = vld [vmem:[#allocation9 + $0x218] sm:$0xf0]  ;;  %v110_v2 = vld [vmem:[#allocation2] sm:$0x3]  ;;  %v1226_v5 = vor.u32 %v1564_v61, %v1223_v62 }
  0x27   :  { %739 = vmatpush.bf16.msrb.mxu0 %v1330_v50  ;;  %v120_v3 = vadd.f32 %v119_v59, %v118_v47  ;;  %v1426_v6 = vor.u32 %v1616_v1, %v1425_v0  ;;  %v1305_v7 = vld [vmem:[#allocation9 + $0x120] sm:$0xf]  ;;  %v1586_v8 = vld [vmem:[#allocation9 + $0x128] sm:$0xf0]  ;;  %v1561_v10 = vld [vmem:[#allocation9 + $0x64] sm:$0xf] }
  0x28   :  { %v127_v4 = vadd.f32 %v126_v60, %v125_v48  ;;  %727 = vmatpush.bf16.msra.mxu3 %v1222_v54  ;;  %v1211_v11 = vld [vmem:[#allocation9 + $0x6c] sm:$0xf0]  ;;  %v1413_v12 = vld [vmem:[#allocation9 + $0x1f8] sm:$0xf]  ;;  %v1197_v14 = vld [vmem:[#allocation9 + $0x48] sm:$0xf]  ;;  %v1306_v18 = vor.u32 %v1586_v8, %v1305_v7 }
  0x29   :  { %765 = vmatpush.bf16.msrb.mxu2 %v1238_v51  ;;  %v1559_v15 = vld [vmem:[#allocation9 + $0x50] sm:$0xf0]  ;;  %v1613_v16 = vld [vmem:[#allocation9 + $0x200] sm:$0xf0]  ;;  %v1293_v20 = vld [vmem:[#allocation9 + $0x108] sm:$0xf]  ;;  %v1214_v21 = vor.u32 %v1561_v10, %v1211_v11 }
  0x2a   :  { %v131_v13 = vsel %vm130_vm2, %v127_v4, %v120_v3  ;;  %752 = vmatpush.bf16.msrb.mxu1 %v1426_v6  ;;  %v1414_v19 = vor.u32 %v1613_v16, %v1413_v12  ;;  %v1583_v22 = vld [vmem:[#allocation9 + $0x110] sm:$0xf0]  ;;  %v1558_v23 = vld [vmem:[#allocation9 + $0x4c] sm:$0xf]  ;;  %v1199_v24 = vld [vmem:[#allocation9 + $0x54] sm:$0xf0]  ;;  %v1198_v25 = vor.u32 %v1559_v15, %v1197_v14 }
  0x2b   :  { %v133_v17 = vadd.f32 %v131_v13, %v110_v2  ;;  %740 = vmatpush.bf16.msrb.mxu0 %v1318_v63  ;;  %v1401_v26 = vld [vmem:[#allocation9 + $0x1e0] sm:$0xf]  ;;  %v1610_v27 = vld [vmem:[#allocation9 + $0x1e8] sm:$0xf0]  ;;  %v1185_v28 = vld [vmem:[#allocation9 + $0x30] sm:$0xf]  ;;  %v1294_v30 = vor.u32 %v1583_v22, %v1293_v20  ;;  %v1202_v32 = vor.u32 %v1558_v23, %v1199_v24 }
  0x2c   :  { %728 = vmatpush.bf16.msra.mxu3 %v1210_v9  ;;  %v1556_v29 = vld [vmem:[#allocation9 + $0x38] sm:$0xf0]  ;;  %v1402_v31 = vor.u32 %v1610_v27, %v1401_v26  ;;  %v1173_v34 = vld [vmem:[#allocation9 + $0x18] sm:$0xf]  ;;  %v1281_v35 = vld [vmem:[#allocation9 + $0xf0] sm:$0xf] }
  0x2d   :  { %766 = vmatpush.bf16.msrb.mxu2 %v1226_v5  ;;  %135 = vst.msk [vmem:[#allocation2] sm:$0x3] %vm108_vm0, %v133_v17  ;;  %v1186_v33 = vor.u32 %v1556_v29, %v1185_v28  ;;  %v1580_v36 = vld [vmem:[#allocation9 + $0xf8] sm:$0xf0]  ;;  %v1553_v37 = vld [vmem:[#allocation9 + $0x20] sm:$0xf0] }
  0x2e   :  { %753 = vmatpush.bf16.msrb.mxu1 %v1414_v19  ;;  %v1555_v38 = vld [vmem:[#allocation9 + $0x34] sm:$0xf]  ;;  %v1187_v39 = vld [vmem:[#allocation9 + $0x3c] sm:$0xf0]  ;;  %v1389_v40 = vld [vmem:[#allocation9 + $0x1c8] sm:$0xf]  ;;  %v1282_v44 = vor.u32 %v1580_v36, %v1281_v35  ;;  %v1174_v46 = vor.u32 %v1553_v37, %v1173_v34 }
  0x2f   :  { %741 = vmatpush.bf16.msrb.mxu0 %v1306_v18  ;;  %v1607_v41 = vld [vmem:[#allocation9 + $0x1d0] sm:$0xf0]  ;;  %v1161_v43 = vld [vmem:[#allocation9] sm:$0xf]  ;;  %v1550_v47 = vld [vmem:[#allocation9 + $0x8] sm:$0xf0]  ;;  %v1190_v48 = vor.u32 %v1555_v38, %v1187_v39 }
  0x30   :  { %729 = vmatpush.bf16.msra.mxu3 %v1198_v25  ;;  %v1269_v49 = vld [vmem:[#allocation9 + $0xd8] sm:$0xf]  ;;  %v1577_v50 = vld [vmem:[#allocation9 + $0xe0] sm:$0xf0]  ;;  %v1594_v51 = vld [vmem:[#allocation9 + $0x16c] sm:$0xf]  ;;  %v1390_v52 = vor.u32 %v1607_v41, %v1389_v40  ;;  %v1162_v59 = vor.u32 %v1550_v47, %v1161_v43 }
  0x31   :  { %767 = vmatpush.bf16.msrb.mxu2 %v1214_v21  ;;  %v1552_v53 = vld [vmem:[#allocation9 + $0x1c] sm:$0xf]  ;;  %v1175_v54 = vld [vmem:[#allocation9 + $0x24] sm:$0xf0]  ;;  %v1343_v55 = vld [vmem:[#allocation9 + $0x174] sm:$0xf0]  ;;  %v1270_v58 = vor.u32 %v1577_v50, %v1269_v49 }
  0x32   :  { %754 = vmatpush.bf16.msrb.mxu1 %v1402_v31  ;;  %v1377_v56 = vld [vmem:[#allocation9 + $0x1b0] sm:$0xf]  ;;  %v1604_v57 = vld [vmem:[#allocation9 + $0x1b8] sm:$0xf0]  ;;  %v1591_v60 = vld [vmem:[#allocation9 + $0x154] sm:$0xf]  ;;  %v1178_v61 = vor.u32 %v1552_v53, %v1175_v54  ;;  %v1346_v1 = vor.u32 %v1594_v51, %v1343_v55 }
  0x33   :  { %742 = vmatpush.bf16.msrb.mxu0 %v1294_v30  ;;  %v1257_v62 = vld [vmem:[#allocation9 + $0xc0] sm:$0xf]  ;;  %v1574_v63 = vld [vmem:[#allocation9 + $0xc8] sm:$0xf0]  ;;  %v1549_v0 = vld [vmem:[#allocation9 + $0x4] sm:$0xf]  ;;  %v1378_v2 = vor.u32 %v1604_v57, %v1377_v56 }
  0x34   :  { %v139_v42 = vld [vmem:[#allocation2] sm:$0x3]  ;;  %730 = vmatpush.bf16.msra.mxu3 %v1186_v33  ;;  %v1163_v3 = vld [vmem:[#allocation9 + $0xc] sm:$0xf0]  ;;  %v1618_v4 = vld [vmem:[#allocation9 + $0x22c] sm:$0xf]  ;;  %v1258_v9 = vor.u32 %v1574_v63, %v1257_v62 }
  0x35   :  { %768 = vmatpush.bf16.msrb.mxu2 %v1202_v32  ;;  %v140_v45 = vpack.c.bf16 %v139_v42, %v139_v42  ;;  %v1439_v5 = vld [vmem:[#allocation9 + $0x234] sm:$0xf0]  ;;  %v1331_v6 = vld [vmem:[#allocation9 + $0x15c] sm:$0xf0]  ;;  %v1349_v7 = vld [vmem:[#allocation9 + $0x170] sm:$0xf]  ;;  %v1166_v12 = vor.u32 %v1549_v0, %v1163_v3 }
  0x36   :  { %755 = vmatpush.bf16.msrb.mxu1 %v1390_v52  ;;  %v1596_v8 = vld [vmem:[#allocation9 + $0x178] sm:$0xf0]  ;;  %v1365_v10 = vld [vmem:[#allocation9 + $0x198] sm:$0xf]  ;;  %v1601_v11 = vld [vmem:[#allocation9 + $0x1a0] sm:$0xf0]  ;;  %v1442_v13 = vor.u32 %v1618_v4, %v1439_v5  ;;  %v1334_v14 = vor.u32 %v1591_v60, %v1331_v6 }
  0x37   :  { %1156 = vmatmul.msk.bf16.vlgmr.msra.gmra.mxu0 %vm113_vm1, %v140_v45  ;;  %1157 = vmatmul.msk.bf16.vlgmr.msra.gmra.mxu1 %vm113_vm1, %v140_v45  ;;  %v1588_v15 = vld [vmem:[#allocation9 + $0x13c] sm:$0xf]  ;;  %v1350_v16 = vor.u32 %v1596_v8, %v1349_v7  ;;  %v1615_v17 = vld [vmem:[#allocation9 + $0x214] sm:$0xf]  ;;  %v1427_v18 = vld [vmem:[#allocation9 + $0x21c] sm:$0xf0]  ;;  %v1366_v20 = vor.u32 %v1601_v11, %v1365_v10 }
  0x38   :  { %1158 = vmatmul.msk.bf16.vlgmr.msra.gmra.mxu2 %vm113_vm1, %v140_v45  ;;  %743 = vmatpush.bf16.msrb.mxu0 %v1282_v44  ;;  %v1319_v19 = vld [vmem:[#allocation9 + $0x144] sm:$0xf0]  ;;  %v1337_v21 = vld [vmem:[#allocation9 + $0x158] sm:$0xf]  ;;  %v1593_v22 = vld [vmem:[#allocation9 + $0x160] sm:$0xf0]  ;;  %v1430_v25 = vor.u32 %v1615_v17, %v1427_v18 }
  0x39   :  { %731 = vmatpush.bf16.msra.mxu3 %v1174_v46  ;;  %769 = vmatpush.bf16.msrb.mxu2 %v1190_v48  ;;  %v1353_v23 = vld [vmem:[#allocation9 + $0x180] sm:$0xf]  ;;  %v1598_v24 = vld [vmem:[#allocation9 + $0x188] sm:$0xf0]  ;;  %v1253_v26 = vld [vmem:[#allocation9 + $0xb0] sm:$0xf]  ;;  %v1322_v28 = vor.u32 %v1588_v15, %v1319_v19  ;;  %v1338_v29 = vor.u32 %v1593_v22, %v1337_v21 }
  0x3a   :  { %756 = vmatpush.bf16.msrb.mxu1 %v1378_v2  ;;  %v1572_v27 = vld [vmem:[#allocation9 + $0xb8] sm:$0xf0]  ;;  %v1585_v30 = vld [vmem:[#allocation9 + $0x124] sm:$0xf]  ;;  %v1307_v31 = vld [vmem:[#allocation9 + $0x12c] sm:$0xf0]  ;;  %v1354_v32 = vor.u32 %v1598_v24, %v1353_v23 }
  0x3b   :  { %v1254_v33 = vor.u32 %v1572_v27, %v1253_v26  ;;  %v1310_v34 = vor.u32 %v1585_v30, %v1307_v31  ;;  %v1582_v35 = vld [vmem:[#allocation9 + $0x10c] sm:$0xf]  ;;  %v1295_v36 = vld [vmem:[#allocation9 + $0x114] sm:$0xf0]  ;;  %v1579_v38 = vld [vmem:[#allocation9 + $0xf4] sm:$0xf] }
  0x3c   :  { %744 = vmatpush.bf16.msrb.mxu0 %v1270_v58  ;;  %v1298_v37 = vor.u32 %v1582_v35, %v1295_v36  ;;  %v1283_v39 = vld [vmem:[#allocation9 + $0xfc] sm:$0xf0]  ;;  %v1612_v41 = vld [vmem:[#allocation9 + $0x1fc] sm:$0xf]  ;;  %v1415_v42 = vld [vmem:[#allocation9 + $0x204] sm:$0xf0] }
  0x3d   :  { %732 = vmatpush.bf16.msra.mxu3 %v1162_v59  ;;  %770 = vmatpush.bf16.msrb.mxu2 %v1178_v61  ;;  %v1286_v40 = vor.u32 %v1579_v38, %v1283_v39  ;;  %v1325_v43 = vld [vmem:[#allocation9 + $0x140] sm:$0xf]  ;;  %v1418_v44 = vor.u32 %v1612_v41, %v1415_v42  ;;  %v1590_v45 = vld [vmem:[#allocation9 + $0x148] sm:$0xf0]  ;;  %v1241_v47 = vld [vmem:[#allocation9 + $0x98] sm:$0xf] }
  0x3e   :  { %757 = vmatpush.bf16.msrb.mxu1 %v1366_v20  ;;  %v1326_v46 = vor.u32 %v1590_v45, %v1325_v43  ;;  %v1569_v48 = vld [vmem:[#allocation9 + $0xa0] sm:$0xf0]  ;;  %v1576_v50 = vld [vmem:[#allocation9 + $0xdc] sm:$0xf]  ;;  %v1271_v51 = vld [vmem:[#allocation9 + $0xe4] sm:$0xf0] }
  0x3f   :  { %v1242_v49 = vor.u32 %v1569_v48, %v1241_v47  ;;  %v1274_v52 = vor.u32 %v1576_v50, %v1271_v51  ;;  %v1609_v53 = vld [vmem:[#allocation9 + $0x1e4] sm:$0xf]  ;;  %v1403_v54 = vld [vmem:[#allocation9 + $0x1ec] sm:$0xf0]  ;;  %v1313_v55 = vld [vmem:[#allocation9 + $0x128] sm:$0xf] }
  0x40   :  { %745 = vmatpush.bf16.msrb.mxu0 %v1258_v9  ;;  %v1406_v56 = vor.u32 %v1609_v53, %v1403_v54  ;;  %v1587_v57 = vld [vmem:[#allocation9 + $0x130] sm:$0xf0]  ;;  %v1229_v59 = vld [vmem:[#allocation9 + $0x80] sm:$0xf]  ;;  %v1566_v60 = vld [vmem:[#allocation9 + $0x88] sm:$0xf0] }
  0x41   :  { %777 = vmatpush.bf16.msrb.mxu3 %v1346_v1  ;;  %771 = vmatpush.bf16.msrb.mxu2 %v1166_v12  ;;  %v1314_v58 = vor.u32 %v1587_v57, %v1313_v55  ;;  %v1230_v61 = vor.u32 %v1566_v60, %v1229_v59  ;;  %v1573_v62 = vld [vmem:[#allocation9 + $0xc4] sm:$0xf]  ;;  %v1259_v63 = vld [vmem:[#allocation9 + $0xcc] sm:$0xf0]  ;;  %v1606_v1 = vld [vmem:[#allocation9 + $0x1cc] sm:$0xf] }
  0x42   :  { %758 = vmatpush.bf16.msrb.mxu1 %v1354_v32  ;;  %v1262_v0 = vor.u32 %v1573_v62, %v1259_v63  ;;  %v1391_v2 = vld [vmem:[#allocation9 + $0x1d4] sm:$0xf0]  ;;  %v1301_v3 = vld [vmem:[#allocation9 + $0x110] sm:$0xf]  ;;  %v1584_v5 = vld [vmem:[#allocation9 + $0x118] sm:$0xf0] }
  0x43   :  { %v1394_v4 = vor.u32 %v1606_v1, %v1391_v2  ;;  %v1302_v6 = vor.u32 %v1584_v5, %v1301_v3  ;;  %v1217_v7 = vld [vmem:[#allocation9 + $0x68] sm:$0xf]  ;;  %v1563_v8 = vld [vmem:[#allocation9 + $0x70] sm:$0xf0]  ;;  %v1379_v11 = vld [vmem:[#allocation9 + $0x1bc] sm:$0xf0] }
  0x44   :  { %790 = vmatpush.bf16.msra.mxu0 %v1442_v13  ;;  %v1218_v9 = vor.u32 %v1563_v8, %v1217_v7  ;;  %v1603_v10 = vld [vmem:[#allocation9 + $0x1b4] sm:$0xf]  ;;  %v1289_v12 = vld [vmem:[#allocation9 + $0xf8] sm:$0xf]  ;;  %v1560_v17 = vld [vmem:[#allocation9 + $0x58] sm:$0xf0] }
  0x45   :  { %778 = vmatpush.bf16.msrb.mxu3 %v1334_v14  ;;  %816 = vmatpush.bf16.msra.mxu2 %v1350_v16  ;;  %v1382_v13 = vor.u32 %v1603_v10, %v1379_v11  ;;  %v1581_v14 = vld [vmem:[#allocation9 + $0x100] sm:$0xf0]  ;;  %v1205_v16 = vld [vmem:[#allocation9 + $0x50] sm:$0xf]  ;;  %v1600_v19 = vld [vmem:[#allocation9 + $0x19c] sm:$0xf] }
  0x46   :  { %803 = vmatpush.bf16.msra.mxu1 %v1254_v33  ;;  %v1290_v15 = vor.u32 %v1581_v14, %v1289_v12  ;;  %v1206_v18 = vor.u32 %v1560_v17, %v1205_v16  ;;  %v1367_v20 = vld [vmem:[#allocation9 + $0x1a4] sm:$0xf0]  ;;  %v1277_v21 = vld [vmem:[#allocation9 + $0xe0] sm:$0xf]  ;;  %v1578_v23 = vld [vmem:[#allocation9 + $0xe8] sm:$0xf0] }
  0x47   :  { %v1370_v22 = vor.u32 %v1600_v19, %v1367_v20  ;;  %v1278_v24 = vor.u32 %v1578_v23, %v1277_v21  ;;  %v1557_v26 = vld [vmem:[#allocation9 + $0x40] sm:$0xf0]  ;;  %v1265_v30 = vld [vmem:[#allocation9 + $0xc8] sm:$0xf]  ;;  %v1575_v31 = vld [vmem:[#allocation9 + $0xd0] sm:$0xf0] }
  0x48   :  { %791 = vmatpush.bf16.msra.mxu0 %v1430_v25  ;;  %v1193_v25 = vld [vmem:[#allocation9 + $0x38] sm:$0xf]  ;;  %v1597_v27 = vld [vmem:[#allocation9 + $0x184] sm:$0xf]  ;;  %v1266_v33 = vor.u32 %v1575_v31, %v1265_v30  ;;  %v1554_v35 = vld [vmem:[#allocation9 + $0x28] sm:$0xf0] }
  0x49   :  { %779 = vmatpush.bf16.msrb.mxu3 %v1322_v28  ;;  %817 = vmatpush.bf16.msra.mxu2 %v1338_v29  ;;  %v1194_v28 = vor.u32 %v1557_v26, %v1193_v25  ;;  %v1355_v29 = vld [vmem:[#allocation9 + $0x18c] sm:$0xf0]  ;;  %v1551_v38 = vld [vmem:[#allocation9 + $0x10] sm:$0xf0]  ;;  %v1620_v48 = vld [vmem:[#allocation9 + $0x238] sm:$0xf0] }
  0x4a   :  { %804 = vmatpush.bf16.msra.mxu1 %v1242_v49  ;;  %v1358_v32 = vor.u32 %v1597_v27, %v1355_v29  ;;  %v1445_v47 = vld [vmem:[#allocation9 + $0x230] sm:$0xf]  ;;  %v1433_v55 = vld [vmem:[#allocation9 + $0x218] sm:$0xf]  ;;  %v1421_v63 = vld [vmem:[#allocation9 + $0x200] sm:$0xf] }
  0x4b   :  { %v1627_v1 = vld [vmem:[#allocation11 + $0x30] sm:$0xff]  ;;  %v1409_v5 = vld [vmem:[#allocation9 + $0x1e8] sm:$0xf]  ;;  %v1608_v11 = vld [vmem:[#allocation9 + $0x1d8] sm:$0xf0] }
  0x4c   :  { %792 = vmatpush.bf16.msra.mxu0 %v1418_v44  ;;  %v1626_v7 = vld [vmem:[#allocation11 + $0x28] sm:$0xff]  ;;  %v1397_v10 = vld [vmem:[#allocation9 + $0x1d0] sm:$0xf]  ;;  %v1625_v12 = vld [vmem:[#allocation11 + $0x20] sm:$0xff] }
  0x4d   :  { %780 = vmatpush.bf16.msrb.mxu3 %v1310_v34  ;;  %818 = vmatpush.bf16.msra.mxu2 %v1326_v46  ;;  %v1181_v34 = vld [vmem:[#allocation9 + $0x20] sm:$0xf]  ;;  %v1385_v14 = vld [vmem:[#allocation9 + $0x1b8] sm:$0xf]  ;;  %v1361_v20 = vld [vmem:[#allocation9 + $0x188] sm:$0xf] }
  0x4e   :  { %805 = vmatpush.bf16.msra.mxu1 %v1230_v61  ;;  %v1182_v36 = vor.u32 %v1554_v35, %v1181_v34  ;;  %v1373_v17 = vld [vmem:[#allocation9 + $0x1a0] sm:$0xf]  ;;  %v1599_v21 = vld [vmem:[#allocation9 + $0x190] sm:$0xf0]  ;;  %v1636_v23 = vld [vmem:[#allocation11 + $0x78] sm:$0xff] }
  0x4f   :  { %v1635_v25 = vld [vmem:[#allocation11 + $0x70] sm:$0xff]  ;;  %v1634_v27 = vld [vmem:[#allocation11 + $0x68] sm:$0xff]  ;;  %v1633_v29 = vld [vmem:[#allocation11 + $0x60] sm:$0xff] }
  0x50   :  { %793 = vmatpush.bf16.msra.mxu0 %v1406_v56  ;;  %v1617_v56 = vld [vmem:[#allocation9 + $0x220] sm:$0xf0]  ;;  %v1623_v26 = vld [vmem:[#allocation11 + $0x10] sm:$0xff]  ;;  %v1644_v31 = vld [vmem:[#allocation11 + $0xb8] sm:$0xff] }
  0x51   :  { %781 = vmatpush.bf16.msrb.mxu3 %v1298_v37  ;;  %819 = vmatpush.bf16.msra.mxu2 %v1314_v58  ;;  %v1169_v37 = vld [vmem:[#allocation9 + $0x8] sm:$0xf]  ;;  %v1628_v58 = vld [vmem:[#allocation11 + $0x38] sm:$0xff]  ;;  %v1434_v61 = vor.u32 %v1617_v56, %v1433_v55  ;;  %v1621_v30 = vld [vmem:[#allocation11] sm:$0xff] }
  0x52   :  { %806 = vmatpush.bf16.msra.mxu1 %v1218_v9  ;;  %v1170_v39 = vor.u32 %v1551_v38, %v1169_v37  ;;  %v1631_v34 = vld [vmem:[#allocation11 + $0x50] sm:$0xff]  ;;  %v1642_v35 = vld [vmem:[#allocation11 + $0xa8] sm:$0xff]  ;;  %v1641_v37 = vld [vmem:[#allocation11 + $0xa0] sm:$0xff] }
  0x53   :  { %v1629_v38 = vld [vmem:[#allocation11 + $0x40] sm:$0xff] }
  0x54   :  { %794 = vmatpush.bf16.msra.mxu0 %v1394_v4 }
  0x55   :  { %782 = vmatpush.bf16.msrb.mxu3 %v1286_v40  ;;  %820 = vmatpush.bf16.msra.mxu2 %v1302_v6  ;;  %v149_v40 = vld [vmem:[#allocation8] sm:$0x7]  ;;  %v1611_v6 = vld [vmem:[#allocation9 + $0x1f0] sm:$0xf0] }
  0x56   :  { %807 = vmatpush.bf16.msra.mxu1 %v1206_v18  ;;  %v151_v41 = vperm.slane %v149_v40, 0  ;;  %v152_v42 = vperm.slane %v149_v40, 1  ;;  %v153_v51 = vperm.slane %v149_v40, 2  ;;  %v1410_v9 = vor.u32 %v1611_v6, %v1409_v5  ;;  %v1602_v18 = vld [vmem:[#allocation9 + $0x1a8] sm:$0xf0]  ;;  %v1639_v40 = vld [vmem:[#allocation11 + $0x90] sm:$0xff] }
  0x57   :  { %v1374_v19 = vor.u32 %v1602_v18, %v1373_v17 }
  0x58   :  { %795 = vmatpush.bf16.msra.mxu0 %v1382_v13  ;;  %v1398_v13 = vor.u32 %v1608_v11, %v1397_v10 }
  0x59   :  { %783 = vmatpush.bf16.msrb.mxu3 %v1274_v52  ;;  %821 = vmatpush.bf16.msra.mxu2 %v1290_v15  ;;  %v1446_v52 = vor.u32 %v1620_v48, %v1445_v47  ;;  %v1605_v15 = vld [vmem:[#allocation9 + $0x1c0] sm:$0xf0] }
  0x5a   :  { %808 = vmatpush.bf16.msra.mxu1 %v1194_v28  ;;  %v1386_v16 = vor.u32 %v1605_v15, %v1385_v14  ;;  %v1622_v28 = vld [vmem:[#allocation11 + $0x8] sm:$0xff] }
  0x5c   :  { %796 = vmatpush.bf16.msra.mxu0 %v1370_v22  ;;  %v1362_v22 = vor.u32 %v1599_v21, %v1361_v20  ;;  %v1083_v20 = vlaneseq  ;;  %v1658_v21 = vld [vmem:[%s1906_s6] ss:$0 sm:$0xff]  ;;  %s1827_s6 = smov [#allocation12]  }
  0x5d   :  { %784 = vmatpush.bf16.msrb.mxu3 %v1262_v0  ;;  %822 = vmatpush.bf16.msra.mxu2 %v1278_v24  ;;  %v1614_v0 = vld [vmem:[#allocation9 + $0x208] sm:$0xf0]  ;;  %v1624_v24 = vld [vmem:[#allocation11 + $0x18] sm:$0xff]  ;;  %s1118_s30 = sshll.u32 %s1827_s6, 4  ;;  %s1119_s30 = int_to_ptr.vmem [resolvable:$true] %s1118_s30 }
  0x5e   :  { %809 = vmatpush.bf16.msra.mxu1 %v1182_v36  ;;  %v1422_v4 = vor.u32 %v1614_v0, %v1421_v63  ;;  %v1630_v36 = vld [vmem:[#allocation11 + $0x48] sm:$0xff] }
  0x60   :  { %797 = vmatpush.bf16.msra.mxu0 %v1358_v32  ;;  %v1632_v32 = vld [vmem:[#allocation11 + $0x58] sm:$0xff] }
  0x61   :  { %823 = vmatpush.bf16.msra.mxu2 %v1266_v33  ;;  %v1643_v33 = vld [vmem:[#allocation11 + $0xb0] sm:$0xff] }
  0x62   :  { %810 = vmatpush.bf16.msra.mxu1 %v1170_v39  ;;  %v1640_v39 = vld [vmem:[#allocation11 + $0x98] sm:$0xff] }
  0xb4   :  { %v201_v43 = vpop.f32.mrf.mxu0  ;;  %v214_v44 = vpop.f32.mrf.mxu1 }
  0xb5   :  { %v202_v45 = vadd.f32 %v201_v43, %v151_v41  ;;  %v215_v46 = vadd.f32 %v214_v44, %v152_v42  ;;  %v333_v42 = vld [vmem:[%s1904_s4] sm:$0x7]  ;;  %v1638_v44 = vld [vmem:[#allocation11 + $0x88] sm:$0xff] }
  0xb6   :  { %v335_v43 = vperm.slane %v333_v42, 0  ;;  %v337_v5 = vperm.slane %v333_v42, 2 }
  0xb7   :  { %v231_v49 = vmax.f32 %v202_v45, 0.0  ;;  %v232_v50 = vmax.f32 %v215_v46, 0.0 }
  0xb9   :  { %v234_v53 = vpack.c.bf16 %v231_v49, %v231_v49  ;;  %v235_v54 = vpack.c.bf16 %v232_v50, %v232_v50 }
  0xbb   :  { %v227_v57 = vpop.f32.mrf.mxu2  ;;  %733 = vmatmul.bf16.vlgmr.msra.gmra.mxu3 %v234_v53  ;;  %746 = vmatmul.bf16.vlgmr.msrb.gmra.mxu0 %v235_v54 }
  0xbc   :  { %v228_v59 = vadd.f32 %v227_v57, %v153_v51  ;;  %772 = vmatmul.bf16.vlgmr.msrb.gmra.mxu2 %v234_v53  ;;  %v203_v60 = vpop.f32.mrf.mxu0  ;;  %829 = vmatpush.bf16.msra.mxu3 %v1446_v52  ;;  %v216_v62 = vpop.f32.mrf.mxu1  ;;  %v1637_v51 = vld [vmem:[#allocation11 + $0x80] sm:$0xff] }
  0xbd   :  { %1044 = vmatpush.bf16.msrb.mxu0 %v1628_v58  ;;  %1070 = vmatpush.bf16.msrb.mxu2 %v1644_v31 }
  0xbe   :  { %v233_v2 = vmax.f32 %v228_v59, 0.0  ;;  %v336_v59 = vperm.slane %v333_v42, 1 }
  0xc0   :  { %v236_v3 = vpack.c.bf16 %v233_v2, %v233_v2  ;;  %830 = vmatpush.bf16.msra.mxu3 %v1434_v61 }
  0xc1   :  { %1045 = vmatpush.bf16.msrb.mxu0 %v1627_v1  ;;  %1071 = vmatpush.bf16.msrb.mxu2 %v1643_v33 }
  0xc2   :  { %759 = vmatmul.bf16.vlgmr.msrb.gmra.mxu1 %v236_v3 }
  0xc3   :  { %v229_v8 = vpop.f32.mrf.mxu2  ;;  %1057 = vmatpush.bf16.msrb.mxu1 %v1636_v23 }
  0xc4   :  { %831 = vmatpush.bf16.msra.mxu3 %v1422_v4 }
  0xc5   :  { %1046 = vmatpush.bf16.msrb.mxu0 %v1626_v7  ;;  %1072 = vmatpush.bf16.msrb.mxu2 %v1642_v35 }
  0xc7   :  { %1058 = vmatpush.bf16.msrb.mxu1 %v1635_v25 }
  0xc8   :  { %832 = vmatpush.bf16.msra.mxu3 %v1410_v9 }
  0xc9   :  { %1047 = vmatpush.bf16.msrb.mxu0 %v1625_v12  ;;  %1073 = vmatpush.bf16.msrb.mxu2 %v1641_v37 }
  0xcb   :  { %785 = vmatmul.bf16.vlgmr.msrb.gmra.mxu3 %v235_v54  ;;  %798 = vmatmul.bf16.vlgmr.msra.gmra.mxu0 %v236_v3 }
  0xcc   :  { %824 = vmatmul.bf16.vlgmr.msra.gmra.mxu2 %v235_v54  ;;  %833 = vmatpush.bf16.msra.mxu3 %v1398_v13 }
  0xcd   :  { %1048 = vmatpush.bf16.msrb.mxu0 %v1624_v24  ;;  %1059 = vmatpush.bf16.msrb.mxu1 %v1634_v27 }
  0xce   :  { %1074 = vmatpush.bf16.msrb.mxu2 %v1640_v39 }
  0xd0   :  { %834 = vmatpush.bf16.msra.mxu3 %v1386_v16 }
  0xd1   :  { %1049 = vmatpush.bf16.msrb.mxu0 %v1623_v26  ;;  %1060 = vmatpush.bf16.msrb.mxu1 %v1633_v29 }
  0xd2   :  { %811 = vmatmul.bf16.vlgmr.msra.gmra.mxu1 %v234_v53  ;;  %1075 = vmatpush.bf16.msrb.mxu2 %v1639_v40 }
  0xd4   :  { %835 = vmatpush.bf16.msra.mxu3 %v1374_v19 }
  0xd5   :  { %1050 = vmatpush.bf16.msrb.mxu0 %v1622_v28  ;;  %1061 = vmatpush.bf16.msrb.mxu1 %v1632_v32 }
  0xd6   :  { %1076 = vmatpush.bf16.msrb.mxu2 %v1638_v44 }
  0xd8   :  { %836 = vmatpush.bf16.msra.mxu3 %v1362_v22  ;;  %v1084_v22 = vand.u32 127, %v1083_v20 }
  0xd9   :  { %1051 = vmatpush.bf16.msrb.mxu0 %v1621_v30  ;;  %1062 = vmatpush.bf16.msrb.mxu1 %v1631_v34 }
  0xda   :  { %1077 = vmatpush.bf16.msrb.mxu2 %v1637_v51  ;;  %vm1085_vm3 = vcmp.lt.s32.totalorder %v1084_v22, 6 }
  0xdb   :  { %837 = vmatmul.bf16.vlgmr.msra.gmra.mxu3 %v236_v3 }
  0xdd   :  { %1063 = vmatpush.bf16.msrb.mxu1 %v1630_v36 }
  0xe1   :  { %1064 = vmatpush.bf16.msrb.mxu1 %v1629_v38 }
 0x138   :  { %v747_v41 = vpop.f32.mrf.mxu0 }
 0x13e   :  { %v734_v45 = vpop.f32.mrf.mxu3 }
 0x13f   :  { %v735_v46 = vadd.f32 %v734_v45, %v335_v43  ;;  %v760_v47 = vpop.f32.mrf.mxu1  ;;  %v773_v48 = vpop.f32.mrf.mxu2 }
 0x140   :  { %v749_v49 = vpop.f32.mrf.mxu0  ;;  %v774_v60 = vadd.f32 %v773_v48, %v336_v59 }
 0x141   :  { %v748_v50 = vadd.f32 %v747_v41, %v735_v46 }
 0x143   :  { %v761_v52 = vadd.f32 %v760_v47, %v748_v50 }
 0x145   :  { %v842_v53 = vmax.f32 %v761_v52, 0.0 }
 0x146   :  { %v736_v54 = vpop.f32.mrf.mxu3 }
 0x147   :  { %v845_v55 = vpack.c.bf16 %v842_v53, %v842_v53  ;;  %v762_v56 = vpop.f32.mrf.mxu1  ;;  %v775_v57 = vpop.f32.mrf.mxu2 }
 0x148   :  { %v799_v58 = vpop.f32.mrf.mxu0 }
 0x149   :  { %1052 = vmatmul.bf16.vlgmr.msrb.gmra.mxu0 %v845_v55 }
 0x14e   :  { %v786_v61 = vpop.f32.mrf.mxu3 }
 0x14f   :  { %v787_v62 = vadd.f32 %v786_v61, %v774_v60  ;;  %v812_v63 = vpop.f32.mrf.mxu1  ;;  %v825_v0 = vpop.f32.mrf.mxu2 }
 0x150   :  { %v801_v1 = vpop.f32.mrf.mxu0  ;;  %v813_v9 = vadd.f32 %v812_v63, %v337_v5 }
 0x151   :  { %v800_v2 = vadd.f32 %v799_v58, %v787_v62 }
 0x152   :  { %v826_v10 = vadd.f32 %v825_v0, %v813_v9 }
 0x153   :  { %v843_v3 = vmax.f32 %v800_v2, 0.0 }
 0x155   :  { %v846_v4 = vpack.c.bf16 %v843_v3, %v843_v3 }
 0x156   :  { %v788_v6 = vpop.f32.mrf.mxu3 }
 0x157   :  { %v814_v7 = vpop.f32.mrf.mxu1  ;;  %v827_v8 = vpop.f32.mrf.mxu2  ;;  %1065 = vmatmul.bf16.vlgmr.msrb.gmra.mxu1 %v846_v4 }
 0x15e   :  { %v838_v11 = vpop.f32.mrf.mxu3 }
 0x15f   :  { %v839_v12 = vadd.f32 %v838_v11, %v826_v10 }
 0x161   :  { %v844_v13 = vmax.f32 %v839_v12, 0.0 }
 0x163   :  { %v847_v14 = vpack.c.bf16 %v844_v13, %v844_v13 }
 0x165   :  { %1078 = vmatmul.bf16.vlgmr.msrb.gmra.mxu2 %v847_v14 }
 0x166   :  { %v840_v15 = vpop.f32.mrf.mxu3 }
 0x1c6   :  { %v1053_v16 = vpop.f32.mrf.mxu0 }
 0x1c7   :  { %v1054_v23 = vadd.f32 %v1658_v21, %v1053_v16 }
 0x1ce   :  { %v1055_v17 = vpop.f32.mrf.mxu0 }
 0x1d4   :  { %v1066_v18 = vpop.f32.mrf.mxu1 }
 0x1d5   :  { %v1067_v24 = vadd.f32 %v1066_v18, %v1054_v23 }
 0x1dc   :  { %v1068_v19 = vpop.f32.mrf.mxu1 }
 0x1e8   :  { %v1079_v25 = vpop.f32.mrf.mxu2 }
 0x1e9   :  { %v1080_v26 = vadd.f32 %v1079_v25, %v1067_v24 }
 0x1eb   :  { %v1086_v27 = vsel %vm1085_vm3, %v1080_v26, -1e+30 }
 0x1ec   :  { %v1088_v28 = vsel %vm1087_vm4, %v1086_v27, -inf }
 0x1ed   :  { %1089 = vmax.xlane.f32.xlu0 %v1088_v28 }
 0x1f0   :  { %v1081_v29 = vpop.f32.mrf.mxu2 }
 0x260   :  { %v1090_v30 = vpop.xlane.xlu0 %1089 }
 0x261   :  { %v1091_v31 = vsub.f32 %v1086_v27, %v1090_v30 }
 0x263   :  { %v1092_v32 = vmul.f32 1.442695, %v1091_v31 }
 0x265   :  { %1659 = vpow2.f32 %v1092_v32 }
 0x26b   :  { %v1660_v33 = vpop.eup %1659 }
 0x26c   :  { %v1094_v34 = vsel %vm1087_vm4, %v1660_v33, 0.0 }
 0x26d   :  { %1095 = vadd.xlane.f32.xlu0 %v1094_v34 }
 0x2e0   :  { %v1096_v35 = vpop.xlane.xlu0 %1095 }
 0x2e1   :  { %1661 = vrcp.f32 %v1096_v35  ;;  %v1108_v39 = vand.u32 2147483648, %v1096_v35  ;;  %v1106_v41 = vand.u32 2147483647, %v1096_v35  ;;  %vm1102_vm6 = vweird.f32 %v1096_v35 }
 0x2e3   :  { %v1109_v43 = vor.u32 1.1754944e-38, %v1108_v39  ;;  %vm1107_vm8 = vcmp.eq.f32.partialorder %v1106_v41, 8.507059e+37 }
 0x2e7   :  { %v1662_v36 = vpop.eup %1661 }
 0x2e8   :  { %v1098_v37 = vmul.f32 %v1662_v36, %v1096_v35  ;;  %vm1103_vm5 = vweird.f32 %v1662_v36 }
 0x2e9   :  { %vm1104_vm7 = vmor %vm1102_vm6, %vm1103_vm5 }
 0x2ea   :  { %v1099_v38 = vsub.f32 1.0, %v1098_v37 }
 0x2ec   :  { %v1100_v40 = vmul.f32 %v1662_v36, %v1099_v38 }
 0x2ee   :  { %v1101_v42 = vadd.f32 %v1662_v36, %v1100_v40 }
 0x2f0   :  { %v1105_v44 = vsel %vm1104_vm7, %v1662_v36, %v1101_v42 }
 0x2f1   :  { %v1110_v45 = vsel %vm1107_vm8, %v1109_v43, %v1105_v44 }
 0x2f2   :  { %v1111_v46 = vmul.f32 %v1660_v33, %v1110_v45 }
 0x2f4   :  { %1112 = vst [vmem:[#allocation12] sm:$0x3] %v1111_v46 }
 0x2f5   :  { %1123 = dma.vmem_to_hbm [thread:$0]  %s1119_s30, 32, %s1121_s10, [#allocation5]  }
 0x2f6   :  { %1813 = dma.done.wait [#allocation5], 32  }
 0x2f7   :  { %1814 = vsyncadd [#allocation5], 4294967264 }
 0x2f8   :  { %1128 = vsyncpa [#allocation4], 1 }
 0x2f9   :  { %1129 = vsyncpa [#allocation7], 1 }
 0x2fa   :  { %1130 = vsyncpa [#allocation10], 1 }
 0x2fb   :  { %1131 = vsyncpa [#allocation5], 1 }

</bundles_post_ra>
